<compile_context>
chip_gen: v7x
topology: tpu7x:2x2x1
jax: 0.10.0
libtpu: 0.0.40
codegen_flags: <defaults>
</compile_context>

<pallas_src>
import functools

import jax
import jax.numpy as jnp
import numpy as np
from jax.experimental import pallas as pl
from jax.experimental.pallas import tpu as pltpu


def _round_up(v, m):
    return (v + m - 1) // m * m


def fp_kernel(xw_ref, pos_t_ref, batch_ref, pos_skip_ref, batch_skip_ref,
              x_skip_ref, w1b_ref, b1_ref, w2_ref, b2_ref, out_ref, *, k, h_dim):
    pos_t = pos_t_ref[...]          # [3, Np]  f32 source positions (transposed, padded)
    pos_s = pos_skip_ref[...]       # [tM, 3]  f32 target positions (this tile)

    # Exact f32 pairwise squared distances on the VPU (ranking must match the
    # reference bit-for-bit, so no MXU here). Batch mask folded into D in place.
    diff = pos_s[:, 0:1] - pos_t[0:1, :]                  # [tM,1] - [1,Np] -> [tM,Np]
    d2 = diff * diff
    for c in range(1, 3):
        diff = pos_s[:, c:c + 1] - pos_t[c:c + 1, :]
        d2 = d2 + diff * diff

    big = jnp.float32(1e30)
    D = jnp.where(batch_skip_ref[...] == batch_ref[...], d2, big)   # [tM, Np]

    # Iterative k-min extraction -> sparse, row-rescaled weight matrix W in [0,1].
    # One cross-lane reduction per iteration; D==dmin selects the unique argmin
    # (exact float ties essentially never occur for real point-cloud data).
    W = jnp.zeros_like(D)
    scale = None
    for i in range(k):
        dmin = jnp.min(D, axis=1, keepdims=True)          # [tM,1] single XLU reduction
        if i == 0:
            scale = jnp.maximum(dmin, 1e-16)              # row scale -> W entries <= 1
        sel = D == dmin
        w = scale / jnp.maximum(dmin, 1e-16)              # [tM,1] exact divide (tiny)
        W = jnp.where(sel, w, W)
        if i + 1 < k:
            D = jnp.where(sel, big, D)

    # One lane-dense MXU matmul does gather + weight-sum + first Linear:
    #   xw_ref = [x @ W1a | 1 | 0...]  =>  W @ xw_ref = [(W @ x) @ W1a | sum(W) | 0...]
    # The row scale cancels in nd / den.
    nd = jnp.dot(W, xw_ref[...], preferred_element_type=jnp.float32)     # [tM, HP]
    den = nd[:, h_dim:h_dim + 1]                                         # [tM, 1] >= 1
    interp_w1a = nd * pl.reciprocal(den)                                 # exact 1/den

    # + x_skip @ W1b (the concat half) + bias, ReLU — all padded to 128 lanes.
    h = interp_w1a + jnp.dot(x_skip_ref[...], w1b_ref[...],
                             preferred_element_type=jnp.float32) + b1_ref[...]
    h = jnp.maximum(h, 0.0)

    o = jnp.dot(h, w2_ref[...], preferred_element_type=jnp.float32) + b2_ref[...]
    out_ref[...] = jnp.maximum(o, 0.0).astype(out_ref.dtype)


def _choose_tile_m(m, budget_rows):
    """Align tile_m to the MXU edge and keep >=2 grid steps for v7x megacore."""
    t = int(budget_rows)
    if t >= 256:
        t = t // 256 * 256
    elif t >= 128:
        t = 128
    else:
        return max(8, min(_round_up(t, 8), _round_up(m, 8)))
    m128 = _round_up(m, 128)
    t = min(t, m128)
    if m >= 256:  # two TensorCores on v7x: make sure the grid has >= 2 steps
        t = min(t, max(128, (m128 // 2) // 128 * 128))
    return t


def fp_module_forward(x, pos, batch, x_skip, pos_skip, batch_skip, params, *,
                      k, tile_m=None):
    """Pallas-backed FPModule.forward; returns (features, pos_skip, batch_skip)."""
    n, c1 = x.shape
    m = pos_skip.shape[0]
    c2 = x_skip.shape[1]
    h_dim, c_out = params["w2"].shape

    hp = _round_up(h_dim + 1, 128)     # hidden lanes (+1 "ones" column carrying den)
    cop = _round_up(c_out, 128)        # lane-dense output channels
    n_pad = _round_up(n, 256)          # lane-dense source axis (full MXU K-tiles)

    w1 = params["w1"].astype(jnp.float32)
    w1a, w1b = w1[:c1], w1[c1:]        # rows hitting interp / rows hitting x_skip

    # Reassociation: precompute x @ W1a once (tiny, outside the kernel) and append a
    # ones column so the kernel's W-matmul also produces the weight sum.
    xw = jnp.dot(x.astype(jnp.float32), w1a, precision=jax.lax.Precision.HIGHEST)
    xw_aug = jnp.zeros((n_pad, hp), jnp.float32)
    xw_aug = xw_aug.at[:n, :h_dim].set(xw)
    xw_aug = xw_aug.at[:n, h_dim].set(1.0)

    # Source positions / batch ids, padded along N. Sentinel -2 for padded sources
    # (distinct from the -1 used for padded TARGET rows) so they never match anything.
    pos_t_p = jnp.zeros((3, n_pad), jnp.float32).at[:, :n].set(pos.T.astype(jnp.float32))
    batch_p = jnp.full((1, n_pad), -2, jnp.int32).at[0, :n].set(batch.astype(jnp.int32))

    w1b_p = jnp.zeros((c2, hp), jnp.float32).at[:, :h_dim].set(w1b)
    b1_p = jnp.zeros((1, hp), jnp.float32).at[0, :h_dim].set(
        params["b1"].astype(jnp.float32))
    w2_p = jnp.zeros((hp, cop), jnp.float32).at[:h_dim, :c_out].set(
        params["w2"].astype(jnp.float32))
    b2_p = jnp.zeros((1, cop), jnp.float32).at[0, :c_out].set(
        params["b2"].astype(jnp.float32))

    # Generation-aware VMEM limit: ~96 MiB on v5e/v6e (128 MiB physical),
    # ~48 MiB on v7x (64 MiB physical). Fallback is v7x-safe.
    try:
        vmem_cap = int(pltpu.get_tpu_info().vmem_capacity_bytes)
    except Exception:
        vmem_cap = 64 * 1024 * 1024
    vmem_limit = min(vmem_cap * 3 // 4, 96 * 1024 * 1024)

    # VMEM-resident (constant index_map) bytes: xw_aug, pos^T, batch, W1b, b1, W2, b2.
    resident_bytes = 4 * (n_pad * hp + 4 * n_pad + c2 * hp + hp + hp * cop + cop)

    if tile_m is None:
        avail = vmem_limit - resident_bytes - (4 << 20)   # headroom for compiler scratch
        # Per target row: ~3-4 live [*, Np] f32 temps in the k-min loop (+margin),
        # double-buffered per-tile inputs/outputs, and the [*, HP] matmul temporaries.
        per_row = 4 * (5 * n_pad + 2 * (4 + c2 + cop) + 4 * hp)
        budget_rows = max(8, avail // per_row)
        tile_m = _choose_tile_m(m, min(budget_rows, 1024))
    else:
        tile_m = max(8, _round_up(int(tile_m), 8))
        tile_m = min(tile_m, _round_up(m, 8))
    m_pad = _round_up(m, tile_m)

    # Pad targets to a whole number of tiles; sentinel batch id -1 keeps padded rows
    # out of every neighborhood, and their (finite) outputs are sliced off below.
    pos_skip_p = jnp.zeros((m_pad, 3), jnp.float32).at[:m].set(
        pos_skip.astype(jnp.float32))
    batch_skip_p = jnp.full((m_pad, 1), -1, jnp.int32).at[:m, 0].set(
        batch_skip.astype(jnp.int32))
    x_skip_p = jnp.zeros((m_pad, c2), jnp.float32).at[:m].set(
        x_skip.astype(jnp.float32))

    resident = lambda i: (0, 0)   # stays in VMEM across the whole M grid
    tiled = lambda i: (i, 0)      # blocked by tile_m rows (default Buffered(2))

    out = pl.pallas_call(
        functools.partial(fp_kernel, k=k, h_dim=h_dim),
        grid=(m_pad // tile_m,),
        out_shape=jax.ShapeDtypeStruct((m_pad, cop), jnp.float32),
        in_specs=[
            pl.BlockSpec((n_pad, hp), resident),   # xw_aug = [x @ W1a | 1 | 0]
            pl.BlockSpec((3, n_pad), resident),    # pos^T (padded)
            pl.BlockSpec((1, n_pad), resident),    # batch (padded, sentinel -2)
            pl.BlockSpec((tile_m, 3), tiled),      # pos_skip tile
            pl.BlockSpec((tile_m, 1), tiled),      # batch_skip tile
            pl.BlockSpec((tile_m, c2), tiled),     # x_skip tile
            pl.BlockSpec((c2, hp), resident),      # W1b (lane padded)
            pl.BlockSpec((1, hp), resident),       # b1  (lane padded)
            pl.BlockSpec((hp, cop), resident),     # W2  (lane padded)
            pl.BlockSpec((1, cop), resident),      # b2  (lane padded)
        ],
        out_specs=pl.BlockSpec((tile_m, cop), tiled),
        compiler_params=pltpu.CompilerParams(
            dimension_semantics=("parallel",),     # megacore on v7x
            vmem_limit_bytes=int(vmem_limit),
        ),
    )(xw_aug, pos_t_p, batch_p, pos_skip_p, batch_skip_p, x_skip_p,
      w1b_p, b1_p, w2_p, b2_p)

    # Skip the extra HBM pass entirely when no padding was added.
    if m_pad == m and cop == c_out:
        feats = out
    else:
        feats = out[:m, :c_out]
    return feats, pos_skip, batch_skip


def fp_reference(x, pos, batch, x_skip, pos_skip, batch_skip, params, *, k):
    """Pure-JAX reference (torch_geometric knn_interpolate + Linear/ReLU MLP)."""
    d2 = jnp.sum((pos_skip[:, None, :] - pos[None, :, :]) ** 2, axis=-1)
    d2 = jnp.where(batch_skip[:, None] == batch[None, :], d2, 1e30)
    neg_d, idx = jax.lax.top_k(-d2, k)                      # k smallest distances
    w = 1.0 / jnp.maximum(-neg_d, 1e-16)                    # [M, k]
    feats = x[idx]                                          # [M, k, C1]
    interp = jnp.sum(feats * w[..., None], axis=1) / jnp.sum(w, axis=1, keepdims=True)
    h = jnp.concatenate([interp, x_skip], axis=1)
    h = jnp.maximum(jnp.dot(h, params["w1"], precision=jax.lax.Precision.HIGHEST)
                    + params["b1"], 0.0)
    o = jnp.maximum(jnp.dot(h, params["w2"], precision=jax.lax.Precision.HIGHEST)
                    + params["b2"], 0.0)
    return o


if __name__ == "__main__":
    key = jax.random.PRNGKey(0)
    N, M = 64, 384                      # coarse (source) / fine (skip, target) points
    C1, C2, H, COUT = 32, 32, 64, 128   # x channels, x_skip channels, hidden, output
    K = 3
    ks = jax.random.split(key, 8)

    x = jax.random.normal(ks[0], (N, C1), jnp.float32)
    pos = jax.random.uniform(ks[1], (N, 3), jnp.float32)
    x_skip = jax.random.normal(ks[2], (M, C2), jnp.float32)
    pos_skip = jax.random.uniform(ks[3], (M, 3), jnp.float32)
    batch = jnp.concatenate([jnp.zeros(N // 2, jnp.int32), jnp.ones(N // 2, jnp.int32)])
    batch_skip = jnp.concatenate([jnp.zeros(M // 2, jnp.int32), jnp.ones(M // 2, jnp.int32)])

    params = {
        "w1": jax.random.normal(ks[4], (C1 + C2, H), jnp.float32) / jnp.sqrt(C1 + C2),
        "b1": 0.01 * jax.random.normal(ks[5], (H,), jnp.float32),
        "w2": jax.random.normal(ks[6], (H, COUT), jnp.float32) / jnp.sqrt(H),
        "b2": 0.01 * jax.random.normal(ks[7], (COUT,), jnp.float32),
    }

    # Auto tile sizing: for M=384 this yields MXU-aligned tiles and a multi-step
    # grid (>=2 steps), exercising both the padding and the megacore-split paths.
    out, pos_out, batch_out = fp_module_forward(
        x, pos, batch, x_skip, pos_skip, batch_skip, params, k=K)
    jax.block_until_ready(out)

    ref = fp_reference(x, pos, batch, x_skip, pos_skip, batch_skip, params, k=K)
    # Tolerance reflects DEFAULT-precision (bf16-pass) MXU matmuls in the kernel vs.
    # the HIGHEST-precision reference (weights are row-normalized to [0,1] so the
    # bf16 pass is well conditioned; reciprocals are exact).
    np.testing.assert_allclose(np.asarray(out), np.asarray(ref), rtol=2e-2, atol=2e-2)
    assert out.shape == (M, COUT) and pos_out.shape == pos_skip.shape
    print("KERNEL_OK")
</pallas_src>

<mosaic_0001>
module attributes {stable_mosaic.version = 11 : i64} {
  func.func @fp_kernel(%arg0: i32, %arg1: memref<256x128xf32, #tpu.memory_space<vmem>>, %arg2: memref<3x256xf32, #tpu.memory_space<vmem>>, %arg3: memref<1x256xi32, #tpu.memory_space<vmem>>, %arg4: memref<128x3xf32, #tpu.memory_space<vmem>>, %arg5: memref<128x1xi32, #tpu.memory_space<vmem>>, %arg6: memref<128x32xf32, #tpu.memory_space<vmem>>, %arg7: memref<32x128xf32, #tpu.memory_space<vmem>>, %arg8: memref<1x128xf32, #tpu.memory_space<vmem>>, %arg9: memref<128x128xf32, #tpu.memory_space<vmem>>, %arg10: memref<1x128xf32, #tpu.memory_space<vmem>>, %arg11: memref<128x128xf32, #tpu.memory_space<vmem>>) attributes {dimension_semantics = [#tpu.dimension_semantics<parallel>], iteration_bounds = array<i64: 3>, scalar_prefetch = 0 : i64, scratch_operands = 0 : i64, tpu.core_type = #tpu.core_type<tc>, window_params = [{pipeline_mode = #tpu.pipeline_mode<synchronous>, transform_indices = @transform_0, window_bounds = array<i64: 256, 128>}, {pipeline_mode = #tpu.pipeline_mode<synchronous>, transform_indices = @transform_1, window_bounds = array<i64: 3, 256>}, {pipeline_mode = #tpu.pipeline_mode<synchronous>, transform_indices = @transform_2, window_bounds = array<i64: 1, 256>}, {transform_indices = @transform_3, window_bounds = array<i64: 128, 3>}, {transform_indices = @transform_4, window_bounds = array<i64: 128, 1>}, {transform_indices = @transform_5, window_bounds = array<i64: 128, 32>}, {pipeline_mode = #tpu.pipeline_mode<synchronous>, transform_indices = @transform_6, window_bounds = array<i64: 32, 128>}, {pipeline_mode = #tpu.pipeline_mode<synchronous>, transform_indices = @transform_7, window_bounds = array<i64: 1, 128>}, {pipeline_mode = #tpu.pipeline_mode<synchronous>, transform_indices = @transform_8, window_bounds = array<i64: 128, 128>}, {pipeline_mode = #tpu.pipeline_mode<synchronous>, transform_indices = @transform_9, window_bounds = array<i64: 1, 128>}, {transform_indices = @transform_10, window_bounds = array<i64: 128, 128>}]} {
    %c0 = arith.constant 0 : index
    %c0_0 = arith.constant 0 : index
    %0 = vector.load %arg2[%c0, %c0_0] : memref<3x256xf32, #tpu.memory_space<vmem>>, vector<3x256xf32>
    %c0_1 = arith.constant 0 : index
    %c0_2 = arith.constant 0 : index
    %1 = vector.load %arg4[%c0_1, %c0_2] : memref<128x3xf32, #tpu.memory_space<vmem>>, vector<128x3xf32>
    %2 = vector.extract_strided_slice %1 {offsets = [0, 0], sizes = [128, 1], strides = [1, 1]} : vector<128x3xf32> to vector<128x1xf32>
    %3 = vector.extract_strided_slice %0 {offsets = [0, 0], sizes = [1, 256], strides = [1, 1]} : vector<3x256xf32> to vector<1x256xf32>
    %4 = vector.broadcast %2 : vector<128x1xf32> to vector<128x256xf32>
    %5 = vector.broadcast %3 : vector<1x256xf32> to vector<128x256xf32>
    %6 = arith.subf %4, %5 : vector<128x256xf32>
    %7 = arith.mulf %6, %6 : vector<128x256xf32>
    %8 = vector.extract_strided_slice %1 {offsets = [0, 1], sizes = [128, 1], strides = [1, 1]} : vector<128x3xf32> to vector<128x1xf32>
    %9 = vector.extract_strided_slice %0 {offsets = [1, 0], sizes = [1, 256], strides = [1, 1]} : vector<3x256xf32> to vector<1x256xf32>
    %10 = vector.broadcast %8 : vector<128x1xf32> to vector<128x256xf32>
    %11 = vector.broadcast %9 : vector<1x256xf32> to vector<128x256xf32>
    %12 = arith.subf %10, %11 : vector<128x256xf32>
    %13 = arith.mulf %12, %12 : vector<128x256xf32>
    %14 = arith.addf %7, %13 : vector<128x256xf32>
    %15 = vector.extract_strided_slice %1 {offsets = [0, 2], sizes = [128, 1], strides = [1, 1]} : vector<128x3xf32> to vector<128x1xf32>
    %16 = vector.extract_strided_slice %0 {offsets = [2, 0], sizes = [1, 256], strides = [1, 1]} : vector<3x256xf32> to vector<1x256xf32>
    %17 = vector.broadcast %15 : vector<128x1xf32> to vector<128x256xf32>
    %18 = vector.broadcast %16 : vector<1x256xf32> to vector<128x256xf32>
    %19 = arith.subf %17, %18 : vector<128x256xf32>
    %20 = arith.mulf %19, %19 : vector<128x256xf32>
    %21 = arith.addf %14, %20 : vector<128x256xf32>
    %c0_3 = arith.constant 0 : index
    %c0_4 = arith.constant 0 : index
    %22 = vector.load %arg5[%c0_3, %c0_4] : memref<128x1xi32, #tpu.memory_space<vmem>>, vector<128x1xi32>
    %c0_5 = arith.constant 0 : index
    %c0_6 = arith.constant 0 : index
    %23 = vector.load %arg3[%c0_5, %c0_6] : memref<1x256xi32, #tpu.memory_space<vmem>>, vector<1x256xi32>
    %24 = vector.broadcast %22 : vector<128x1xi32> to vector<128x256xi32>
    %25 = vector.broadcast %23 : vector<1x256xi32> to vector<128x256xi32>
    %26 = arith.cmpi eq, %24, %25 : vector<128x256xi32>
    %cst = arith.constant 1.000000e+30 : f32
    %27 = vector.broadcast %cst : f32 to vector<128x256xf32>
    %28 = arith.select %26, %21, %27 : vector<128x256xi1>, vector<128x256xf32>
    %cst_7 = arith.constant 0.000000e+00 : f32
    %29 = vector.broadcast %cst_7 : f32 to vector<128x256xf32>
    %cst_8 = arith.constant dense<0x7F800000> : vector<128xf32>
    %30 = vector.multi_reduction <minimumf>, %28, %cst_8 [1] : vector<128x256xf32> to vector<128xf32>
    %31 = vector.shape_cast %30 : vector<128xf32> to vector<128x1xf32>
    %cst_9 = arith.constant 1.000000e-16 : f32
    %32 = vector.broadcast %cst_9 : f32 to vector<128x1xf32>
    %33 = arith.maximumf %31, %32 : vector<128x1xf32>
    %34 = vector.broadcast %31 : vector<128x1xf32> to vector<128x256xf32>
    %35 = arith.cmpf oeq, %28, %34 : vector<128x256xf32>
    %cst_10 = arith.constant 1.000000e-16 : f32
    %36 = vector.broadcast %cst_10 : f32 to vector<128x1xf32>
    %37 = arith.maximumf %31, %36 : vector<128x1xf32>
    %38 = arith.divf %33, %37 : vector<128x1xf32>
    %39 = vector.shape_cast %38 : vector<128x1xf32> to vector<128x1xf32>
    %40 = vector.broadcast %39 : vector<128x1xf32> to vector<128x256xf32>
    %41 = arith.select %35, %40, %29 : vector<128x256xi1>, vector<128x256xf32>
    %cst_11 = arith.constant 1.000000e+30 : f32
    %42 = vector.broadcast %cst_11 : f32 to vector<128x256xf32>
    %43 = arith.select %35, %42, %28 : vector<128x256xi1>, vector<128x256xf32>
    %cst_12 = arith.constant dense<0x7F800000> : vector<128xf32>
    %44 = vector.multi_reduction <minimumf>, %43, %cst_12 [1] : vector<128x256xf32> to vector<128xf32>
    %45 = vector.shape_cast %44 : vector<128xf32> to vector<128x1xf32>
    %46 = vector.broadcast %45 : vector<128x1xf32> to vector<128x256xf32>
    %47 = arith.cmpf oeq, %43, %46 : vector<128x256xf32>
    %cst_13 = arith.constant 1.000000e-16 : f32
    %48 = vector.broadcast %cst_13 : f32 to vector<128x1xf32>
    %49 = arith.maximumf %45, %48 : vector<128x1xf32>
    %50 = arith.divf %33, %49 : vector<128x1xf32>
    %51 = vector.shape_cast %50 : vector<128x1xf32> to vector<128x1xf32>
    %52 = vector.broadcast %51 : vector<128x1xf32> to vector<128x256xf32>
    %53 = arith.select %47, %52, %41 : vector<128x256xi1>, vector<128x256xf32>
    %cst_14 = arith.constant 1.000000e+30 : f32
    %54 = vector.broadcast %cst_14 : f32 to vector<128x256xf32>
    %55 = arith.select %47, %54, %43 : vector<128x256xi1>, vector<128x256xf32>
    %cst_15 = arith.constant dense<0x7F800000> : vector<128xf32>
    %56 = vector.multi_reduction <minimumf>, %55, %cst_15 [1] : vector<128x256xf32> to vector<128xf32>
    %57 = vector.shape_cast %56 : vector<128xf32> to vector<128x1xf32>
    %58 = vector.broadcast %57 : vector<128x1xf32> to vector<128x256xf32>
    %59 = arith.cmpf oeq, %55, %58 : vector<128x256xf32>
    %cst_16 = arith.constant 1.000000e-16 : f32
    %60 = vector.broadcast %cst_16 : f32 to vector<128x1xf32>
    %61 = arith.maximumf %57, %60 : vector<128x1xf32>
    %62 = arith.divf %33, %61 : vector<128x1xf32>
    %63 = vector.shape_cast %62 : vector<128x1xf32> to vector<128x1xf32>
    %64 = vector.broadcast %63 : vector<128x1xf32> to vector<128x256xf32>
    %65 = arith.select %59, %64, %53 : vector<128x256xi1>, vector<128x256xf32>
    %c0_17 = arith.constant 0 : index
    %c0_18 = arith.constant 0 : index
    %66 = vector.load %arg1[%c0_17, %c0_18] : memref<256x128xf32, #tpu.memory_space<vmem>>, vector<256x128xf32>
    %cst_19 = arith.constant dense<0.000000e+00> : vector<128x128xf32>
    %67 = tpu.matmul %65, %66, %cst_19 {dimension_numbers = #tpu.dot_dimension_numbers<[1], [0], [0], [1], [0, 0, 1, 1], [], []>} : vector<128x256xf32>, vector<256x128xf32>, vector<128x128xf32> -> vector<128x128xf32>
    %68 = vector.extract_strided_slice %67 {offsets = [0, 64], sizes = [128, 1], strides = [1, 1]} : vector<128x128xf32> to vector<128x1xf32>
    %69 = tpu.reciprocal %68 : vector<128x1xf32> -> vector<128x1xf32>
    %70 = vector.broadcast %69 : vector<128x1xf32> to vector<128x128xf32>
    %71 = arith.mulf %67, %70 : vector<128x128xf32>
    %c0_20 = arith.constant 0 : index
    %c0_21 = arith.constant 0 : index
    %72 = vector.load %arg6[%c0_20, %c0_21] : memref<128x32xf32, #tpu.memory_space<vmem>>, vector<128x32xf32>
    %c0_22 = arith.constant 0 : index
    %c0_23 = arith.constant 0 : index
    %73 = vector.load %arg7[%c0_22, %c0_23] : memref<32x128xf32, #tpu.memory_space<vmem>>, vector<32x128xf32>
    %cst_24 = arith.constant dense<0.000000e+00> : vector<128x128xf32>
    %74 = tpu.matmul %72, %73, %cst_24 {dimension_numbers = #tpu.dot_dimension_numbers<[1], [0], [0], [1], [0, 0, 1, 1], [], []>} : vector<128x32xf32>, vector<32x128xf32>, vector<128x128xf32> -> vector<128x128xf32>
    %75 = arith.addf %71, %74 : vector<128x128xf32>
    %c0_25 = arith.constant 0 : index
    %c0_26 = arith.constant 0 : index
    %76 = vector.load %arg8[%c0_25, %c0_26] : memref<1x128xf32, #tpu.memory_space<vmem>>, vector<1x128xf32>
    %77 = vector.broadcast %76 : vector<1x128xf32> to vector<128x128xf32>
    %78 = arith.addf %75, %77 : vector<128x128xf32>
    %cst_27 = arith.constant 0.000000e+00 : f32
    %79 = vector.broadcast %cst_27 : f32 to vector<128x128xf32>
    %80 = arith.maximumf %78, %79 : vector<128x128xf32>
    %c0_28 = arith.constant 0 : index
    %c0_29 = arith.constant 0 : index
    %81 = vector.load %arg9[%c0_28, %c0_29] : memref<128x128xf32, #tpu.memory_space<vmem>>, vector<128x128xf32>
    %cst_30 = arith.constant dense<0.000000e+00> : vector<128x128xf32>
    %82 = tpu.matmul %80, %81, %cst_30 {dimension_numbers = #tpu.dot_dimension_numbers<[1], [0], [0], [1], [0, 0, 1, 1], [], []>} : vector<128x128xf32>, vector<128x128xf32>, vector<128x128xf32> -> vector<128x128xf32>
    %c0_31 = arith.constant 0 : index
    %c0_32 = arith.constant 0 : index
    %83 = vector.load %arg10[%c0_31, %c0_32] : memref<1x128xf32, #tpu.memory_space<vmem>>, vector<1x128xf32>
    %84 = vector.broadcast %83 : vector<1x128xf32> to vector<128x128xf32>
    %85 = arith.addf %82, %84 : vector<128x128xf32>
    %cst_33 = arith.constant 0.000000e+00 : f32
    %86 = vector.broadcast %cst_33 : f32 to vector<128x128xf32>
    %87 = arith.maximumf %85, %86 : vector<128x128xf32>
    %c0_34 = arith.constant 0 : index
    %c0_35 = arith.constant 0 : index
    %88 = vector.load %arg11[%c0_34, %c0_35] : memref<128x128xf32, #tpu.memory_space<vmem>>, vector<128x128xf32>
    tpu.vector_store %arg11[%c0_34, %c0_35], %87 {strides = array<i32>} : memref<128x128xf32, #tpu.memory_space<vmem>>, vector<128x128xf32>,
    return
  }
  func.func @transform_0(%arg0: i32) -> (i32, i32) {
    %c0_i32 = arith.constant 0 : i32
    %c0_i32_0 = arith.constant 0 : i32
    %c0_i32_1 = arith.constant 0 : i32
    return %c0_i32, %c0_i32_0 : i32, i32
  }
  func.func @transform_1(%arg0: i32) -> (i32, i32) {
    %c0_i32 = arith.constant 0 : i32
    %c0_i32_0 = arith.constant 0 : i32
    %c0_i32_1 = arith.constant 0 : i32
    return %c0_i32, %c0_i32_0 : i32, i32
  }
  func.func @transform_2(%arg0: i32) -> (i32, i32) {
    %c0_i32 = arith.constant 0 : i32
    %c0_i32_0 = arith.constant 0 : i32
    %c0_i32_1 = arith.constant 0 : i32
    return %c0_i32, %c0_i32_0 : i32, i32
  }
  func.func @transform_3(%arg0: i32) -> (i32, i32) {
    %c0_i32 = arith.constant 0 : i32
    %c0_i32_0 = arith.constant 0 : i32
    return %arg0, %c0_i32 : i32, i32
  }
  func.func @transform_4(%arg0: i32) -> (i32, i32) {
    %c0_i32 = arith.constant 0 : i32
    %c0_i32_0 = arith.constant 0 : i32
    return %arg0, %c0_i32 : i32, i32
  }
  func.func @transform_5(%arg0: i32) -> (i32, i32) {
    %c0_i32 = arith.constant 0 : i32
    %c0_i32_0 = arith.constant 0 : i32
    return %arg0, %c0_i32 : i32, i32
  }
  func.func @transform_6(%arg0: i32) -> (i32, i32) {
    %c0_i32 = arith.constant 0 : i32
    %c0_i32_0 = arith.constant 0 : i32
    %c0_i32_1 = arith.constant 0 : i32
    return %c0_i32, %c0_i32_0 : i32, i32
  }
  func.func @transform_7(%arg0: i32) -> (i32, i32) {
    %c0_i32 = arith.constant 0 : i32
    %c0_i32_0 = arith.constant 0 : i32
    %c0_i32_1 = arith.constant 0 : i32
    return %c0_i32, %c0_i32_0 : i32, i32
  }
  func.func @transform_8(%arg0: i32) -> (i32, i32) {
    %c0_i32 = arith.constant 0 : i32
    %c0_i32_0 = arith.constant 0 : i32
    %c0_i32_1 = arith.constant 0 : i32
    return %c0_i32, %c0_i32_0 : i32, i32
  }
  func.func @transform_9(%arg0: i32) -> (i32, i32) {
    %c0_i32 = arith.constant 0 : i32
    %c0_i32_0 = arith.constant 0 : i32
    %c0_i32_1 = arith.constant 0 : i32
    return %c0_i32, %c0_i32_0 : i32, i32
  }
  func.func @transform_10(%arg0: i32) -> (i32, i32) {
    %c0_i32 = arith.constant 0 : i32
    %c0_i32_0 = arith.constant 0 : i32
    return %arg0, %c0_i32 : i32, i32
  }
}

</mosaic_0001>

<bundles_post_ra>
// kernel: tpu_custom_call.1
= control target key start
LH: loop header
LB: loop body
LE: loop exit
PB: predicated region body
PF: predicated region fallthrough
CT: control target
= control target key end

     0   :  { %s4970_s0 = inlined_call_operand.vmem [shape: f32[256,128], index: 0, kind: input, shape index: {}]   ;;  %s4971_s1 = inlined_call_operand.vmem [shape: f32[3,256], index: 1, kind: input, shape index: {}]   ;;  %s4972_s2 = inlined_call_operand.vmem [shape: s32[1,256], index: 2, kind: input, shape index: {}]   ;;  %s4973_s3 = inlined_call_operand.vmem [shape: f32[384,3], index: 3, kind: input, shape index: {}]   ;;  %s4974_s4 = inlined_call_operand.vmem [shape: s32[384,1], index: 4, kind: input, shape index: {}]   ;;  %s4975_s5 = inlined_call_operand.vmem [shape: f32[384,32], index: 5, kind: input, shape index: {}]   ;;  %s4976_s6 = inlined_call_operand.vmem [shape: f32[32,128], index: 6, kind: input, shape index: {}]   ;;  %s4977_s7 = inlined_call_operand.vmem [shape: f32[1,128], index: 7, kind: input, shape index: {}]   ;;  %s4978_s8 = inlined_call_operand.vmem [shape: f32[128,128], index: 8, kind: input, shape index: {}]   ;;  %s4979_s9 = inlined_call_operand.vmem [shape: f32[1,128], index: 9, kind: input, shape index: {}]   ;;  %s4980_s10 = inlined_call_operand.hbm [shape: f32[384,128], index: 10, kind: output, shape index: {}]  }
   0x1   :  { %5037 = sst [smem:[#allocation55_spill]] %s4971_s1 }
   0x2   :  { %15 = vsyncpa [#allocation3], 0 }
   0x3   :  { %17 = vsyncpa [#allocation3 + $0x1], 0  ;;  %s3150_s13 = smov 0   ;;  %s3152_s14 = smov 0  }
   0x4   :  { %s3154_s15 = smov 0   ;;  %s3156_s16 = smov 0  }
   0x5 LB: > { %s3171_s17 = sadd.s32 4294967295, %s3086_s16   ;;  %s2480_s18 = sadd.s32 4294967294, %s3086_s16   ;;  %s3086_s16 = sphi %s3156_s16, %s5179_s16   ;;  %s3082_s15 = sphi %s3154_s15, %s5178_s15   ;;  %s3078_s14 = sphi %s3152_s14, %s5177_s14   ;;  %s3074_s13 = sphi %s3150_s13, %s5176_s13  }
   0x6   : > { %s3175_s19 = sadd.s32 1, %s3086_s16   ;;  %s255_s20 = sadd.s32 1, %s3082_s15 }
   0x7   : > { %s252_s21 = ssub.s32 %s3086_s16, %s3175_s19  ;;  %p265_p0 = scmp.ne.s32.totalorder %s3082_s15, %s3078_s14 }
   0x8   : > { %p253_p1 = scmp.eq.s32.totalorder %s252_s21, 0  ;;  %p266_p2 = scmp.eq.s32.totalorder %s3171_s17, 2 }
   0x9   : > { %p271_p3 = scmp.ne.s32.totalorder %s3078_s14, %s3074_s13  ;;  %p272_p4 = scmp.eq.s32.totalorder %s2480_s18, 2 }
   0xa   : > { %s3186_s22 = scalar_select %p253_p1, %s3082_s15, %s255_s20  }
   0xb   : > { %p3188_p5 = por %p266_p2, %p265_p0  ;;  %p3192_p6 = por %p272_p4, %p271_p3 }
   0xc   : > { %p2483_p7 = scmp.ge.s32.totalorder %s3086_s16, 1  ;;  %p338_p8 = scmp.lt.s32.totalorder %s3086_s16, 4 }
   0xe   : > { %p339_p9 = pnand %p2483_p7, %p338_p8 }
  0x10   : > { %342 = sbr.rel (%p339_p9) target bundleno = 1404 (0x57c), region = 60 }
  0x17   : > { %s2485_s25 = sshll.u32 %s3171_s17, 4  ;;  %v3088_v0 = vmov 2   ;;  %v3089_v3 = vmov 1   ;;  %v3090_v4 = vmov 0   ;;  %v503_v41 = vlaneseq  ;;  %s5040_s1 = sld [smem:[#allocation55_spill]] }
  0x18   : > { %2855 = vset.pattern.permute.xlu0 %v3088_v0  ;;  %2852 = vset.pattern.permute.xlu1 %v3088_v0  ;;  %p387_p10 = scmp.lt.s32.totalorder %s2485_s25, 47  ;;  %s383_s21 = sand.u32 1, %s3078_s14  }
  0x19   : > { %v504_v44 = vshrl.u32 %v503_v41, 7  ;;  %s2484_s27 = sshll.u32 %s383_s21, 7  ;;  %s2514_s28 = sshll.u32 %s3171_s17, 11 }
  0x1a   : > { %s5181_s25 = smov (!%p387_p10, %s2485_s25), 47  ;;  %s4929_s17 = scalar_lea.sflag [#allocation3], %s383_s21 }
  0x1b   : > { %s3201_s26 = sshll.u32 %s5181_s25, 3  ;;  %v651_v47 = vsub.s32 1, %v504_v44  ;;  %v655_v48 = vsub.s32 5, %v504_v44  ;;  %v829_v50 = vsub.s32 2, %v504_v44  ;;  %v833_v52 = vsub.s32 6, %v504_v44  ;;  %s3092_s20 = smov [#allocation2]  }
  0x1c   : > { %s3207_s29 = scalar_lea.vmem %s4973_s3, %s3201_s26  ;;  %s3219_s12 = scalar_lea.vmem %s4974_s4, %s3201_s26  ;;  %v505_v53 = vsub.s32 0, %v504_v44  ;;  %v509_v54 = vsub.s32 4, %v504_v44 }
  0x1d   : > { %v407_v1 = vld [vmem:[%s3207_s29 + $0x8] sm:$0xff]  ;;  %v406_v2 = vld [vmem:[%s3207_s29] sm:$0xff]  ;;  %v408_v5 = vld [vmem:[%s3207_s29 + $0x10] sm:$0xff]  ;;  %s4590_s25 = scalar_lea.vmem %s4975_s5, %s3201_s26 }
  0x1e   : > { %768 = vperm.xlu0 %2855, %v407_v1   ;;  %764 = vperm.xlu1 %2852, %v406_v2   ;;  %v410_v6 = vld [vmem:[%s3207_s29 + $0x20] sm:$0xff]  ;;  %v412_v8 = vld [vmem:[%s3207_s29 + $0x30] sm:$0xff]  ;;  %v942_v12 = vld [vmem:[%s3219_s12 + $0x8] sm:$0xff] }
  0x1f   : > { %v941_v7 = vld [vmem:[%s3219_s12] sm:$0xff]  ;;  %v3230_v10 = vld [vmem:[%s3207_s29 + $0x50] sm:$0xff]  ;;  %v409_v14 = vld [vmem:[%s3207_s29 + $0x18] sm:$0xff] }
  0x20   : > { %v3226_v9 = vld [vmem:[%s3207_s29 + $0x40] sm:$0xff]  ;;  %v3241_v13 = vld [vmem:[%s3207_s29 + $0x70] sm:$0xff]  ;;  %v411_v16 = vld [vmem:[%s3207_s29 + $0x28] sm:$0xff] }
  0x21   : > { %v3235_v11 = vld [vmem:[%s3207_s29 + $0x60] sm:$0xff]  ;;  %v943_v15 = vld [vmem:[%s3219_s12 + $0x10] sm:$0xff]  ;;  %v944_v18 = vld [vmem:[%s3219_s12 + $0x18] sm:$0xff] }
  0x22   : > { %2856 = vset.pattern.permute.xlu0 %v3089_v3  ;;  %2853 = vset.pattern.permute.xlu1 %v3090_v4  ;;  %v945_v17 = vld [vmem:[%s3219_s12 + $0x20] sm:$0xff]  ;;  %v413_v19 = vld [vmem:[%s3207_s29 + $0x38] sm:$0xff]  ;;  %v947_v20 = vld [vmem:[%s3219_s12 + $0x30] sm:$0xff] }
  0x23   : > { %586 = vperm.xlu0 %2856, %v406_v2   ;;  %429 = vperm.xlu1 %2853, %v407_v1   ;;  %v415_v21 = vld [vmem:[%s3207_s29 + $0x48] sm:$0xff]  ;;  %v949_v22 = vld [vmem:[%s3219_s12 + $0x40] sm:$0xff]  ;;  %v417_v23 = vld [vmem:[%s3207_s29 + $0x58] sm:$0xff] }
  0x24   : > { %v951_v24 = vld [vmem:[%s3219_s12 + $0x50] sm:$0xff]  ;;  %v946_v25 = vld [vmem:[%s3219_s12 + $0x28] sm:$0xff]  ;;  %v953_v27 = vld [vmem:[%s3219_s12 + $0x60] sm:$0xff] }
  0x25   : > { %v3268_v26 = vld [vmem:[%s3207_s29 + $0x68] sm:$0xff]  ;;  %v3274_v28 = vld [vmem:[%s3207_s29 + $0x78] sm:$0xff]  ;;  %v955_v29 = vld [vmem:[%s3219_s12 + $0x70] sm:$0xff] }
  0x26   : > { %v948_v30 = vld [vmem:[%s3219_s12 + $0x38] sm:$0xff]  ;;  %v950_v31 = vld [vmem:[%s3219_s12 + $0x48] sm:$0xff]  ;;  %v405_v51 = vld [vmem:[%s5040_s1] sm:$0x77]  ;;  %s4886_s1 = scalar_lea.vmem [#allocation2], %s2484_s27 }
  0x27   : > { %594 = vperm.xlu0 %2856, %v408_v5   ;;  %2854 = vset.pattern.permute.xlu1 %v3089_v3  ;;  %v952_v46 = vld [vmem:[%s3219_s12 + $0x58] sm:$0xff]  ;;  %v652_v55 = vrot.slane %v405_v51, %v651_v47  ;;  %v656_v56 = vrot.slane %v405_v51, %v655_v48  ;;  %v830_v59 = vrot.slane %v405_v51, %v829_v50  ;;  %s2394_s29 = sshll.u32 %s4886_s1, 4  ;;  %s4923_s29 = int_to_ptr.vmem [resolvable:$true] %s2394_s29 }
  0x28   : > { %590 = vperm.xlu1 %2854, %v407_v1   ;;  %v834_v60 = vrot.slane %v405_v51, %v833_v52  ;;  %v506_v61 = vrot.slane %v405_v51, %v505_v53  ;;  %v510_v62 = vrot.slane %v405_v51, %v509_v54  ;;  %s3024_s18 = scalar_lea.vmem %s4923_s29, 2048 }
  0x29   : > { %v3328_v63 = vrot.slane %v652_v55, %v651_v47  ;;  %v3330_v1 = vrot.slane %v656_v56, %v651_v47  ;;  %p3025_p11 = scmp.ne.s32.totalorder %s4923_s29, %s3024_s18 }
  0x2b   : > { %602 = vperm.xlu0 %2856, %v410_v6   ;;  %p3026_p12 = pnand %p3025_p11, %p3188_p5 }
  0x2c   : > { %2857 = vset.pattern.permute.xlu1 %v3090_v4 }
  0x2d   : > { %959 = vperm.xlu1 %2857, %v941_v7   ;;  %p3027_p13 = pneg %p3026_p12 }
  0x2f   : > { %610 = vperm.xlu0 %2856, %v412_v8  }
  0x31   : > { %434 = vperm.xlu1 %2857, %v408_v5  }
  0x33   : > { %618 = vperm.xlu0 %2856, %v3226_v9  }
  0x35   : > { %2858 = vset.pattern.permute.xlu1 %v3088_v0 }
  0x36   : > { %772 = vperm.xlu1 %2858, %v408_v5  }
  0x37   : > { %626 = vperm.xlu0 %2856, %v3230_v10  }
  0x3a   : > { %2859 = vset.pattern.permute.xlu1 %v3090_v4 }
  0x3b   : > { %634 = vperm.xlu0 %2856, %v3235_v11   ;;  %962 = vperm.xlu1 %2859, %v942_v12   ;;  %v3345_v12 = vrot.slane %v510_v62, %v505_v53 }
  0x3f   : > { %642 = vperm.xlu0 %2856, %v3241_v13   ;;  %2860 = vset.pattern.permute.xlu1 %v3089_v3 }
  0x40   : > { %598 = vperm.xlu1 %2860, %v409_v14  }
  0x43   : > { %2888 = vset.pattern.permute.xlu0 %v3090_v4 }
  0x44   : > { %424 = vperm.xlu0 %2888, %v406_v2   ;;  %2861 = vset.pattern.permute.xlu1 %v3088_v0 }
  0x45   : > { %776 = vperm.xlu1 %2861, %v409_v14  }
  0x48   : > { %439 = vperm.xlu0 %2888, %v409_v14  }
  0x49   : > { %2862 = vset.pattern.permute.xlu1 %v3090_v4 }
  0x4a   : > { %444 = vperm.xlu1 %2862, %v410_v6  }
  0x4c   : > { %965 = vperm.xlu0 %2888, %v943_v15  }
  0x4e   : > { %2863 = vset.pattern.permute.xlu1 %v3088_v0 }
  0x4f   : > { %780 = vperm.xlu1 %2863, %v410_v6   ;;  %v3334_v6 = vrot.slane %v830_v59, %v829_v50 }
  0x50   : > { %449 = vperm.xlu0 %2888, %v411_v16  }
  0x53   : > { %2864 = vset.pattern.permute.xlu1 %v3090_v4 }
  0x54   : > { %971 = vperm.xlu0 %2888, %v945_v17   ;;  %968 = vperm.xlu1 %2864, %v944_v18  }
  0x58   : > { %2865 = vset.pattern.permute.xlu1 %v3089_v3  ;;  %459 = vperm.xlu0 %2888, %v413_v19  }
  0x59   : > { %606 = vperm.xlu1 %2865, %v411_v16  }
  0x5c   : > { %977 = vperm.xlu0 %2888, %v947_v20  }
  0x5d   : > { %2866 = vset.pattern.permute.xlu1 %v3088_v0 }
  0x5e   : > { %784 = vperm.xlu1 %2866, %v411_v16  }
  0x60   : > { %469 = vperm.xlu0 %2888, %v415_v21  }
  0x62   : > { %2867 = vset.pattern.permute.xlu1 %v3090_v4 }
  0x63   : > { %454 = vperm.xlu1 %2867, %v412_v8  }
  0x64   : > { %983 = vperm.xlu0 %2888, %v949_v22  }
  0x67   : > { %2868 = vset.pattern.permute.xlu1 %v3088_v0 }
  0x68   : > { %788 = vperm.xlu1 %2868, %v412_v8   ;;  %479 = vperm.xlu0 %2888, %v417_v23  }
  0x6c   : > { %2869 = vset.pattern.permute.xlu1 %v3090_v4  ;;  %989 = vperm.xlu0 %2888, %v951_v24  }
  0x6d   : > { %974 = vperm.xlu1 %2869, %v946_v25  }
  0x70   : > { %489 = vperm.xlu0 %2888, %v3268_v26  }
  0x71   : > { %2870 = vset.pattern.permute.xlu1 %v3089_v3 }
  0x72   : > { %614 = vperm.xlu1 %2870, %v413_v19  }
  0x74   : > { %995 = vperm.xlu0 %2888, %v953_v27  }
  0x76   : > { %2871 = vset.pattern.permute.xlu1 %v3088_v0 }
  0x77   : > { %792 = vperm.xlu1 %2871, %v413_v19  }
  0x78   : > { %499 = vperm.xlu0 %2888, %v3274_v28  }
  0x7b   : > { %2872 = vset.pattern.permute.xlu1 %v3090_v4 }
  0x7c   : > { %464 = vperm.xlu1 %2872, %v3226_v9   ;;  %1001 = vperm.xlu0 %2888, %v955_v29  }
  0x80   : > { %2873 = vset.pattern.permute.xlu1 %v3088_v0 }
  0x81   : > { %796 = vperm.xlu1 %2873, %v3226_v9   ;;  %v957_v9 = vld [vmem:[%s4972_s2] sm:$0x3] }
  0x82   : > { %v3351_v16 = vrot.slane %v957_v9, %v505_v53  ;;  %v3361_v29 = vrot.slane %v957_v9, %v651_v47 }
  0x85   : > { %2874 = vset.pattern.permute.xlu1 %v3090_v4 }
  0x86   : > { %980 = vperm.xlu1 %2874, %v948_v30  }
  0x8a   : > { %2875 = vset.pattern.permute.xlu1 %v3089_v3 }
  0x8b   : > { %622 = vperm.xlu1 %2875, %v415_v21  }
  0x8f   : > { %2876 = vset.pattern.permute.xlu1 %v3088_v0 }
  0x90   : > { %800 = vperm.xlu1 %2876, %v415_v21  }
  0x94   : > { %2877 = vset.pattern.permute.xlu1 %v3090_v4 }
  0x95   : > { %474 = vperm.xlu1 %2877, %v3230_v10  }
  0x99   : > { %2878 = vset.pattern.permute.xlu1 %v3088_v0 }
  0x9a   : > { %804 = vperm.xlu1 %2878, %v3230_v10   ;;  %v3341_v10 = vrot.slane %v834_v60, %v829_v50 }
  0x9d   : > { %v3292_v32 = vpop.permute.xlu1 %764  ;;  %v3294_v33 = vpop.permute.xlu0 %768 }
  0x9e   : > { %2879 = vset.pattern.permute.xlu1 %v3090_v4  ;;  %v845_v25 = vsub.f32 %v3292_v32, %v3334_v6 }
  0x9f   : > { %986 = vperm.xlu1 %2879, %v950_v31  }
  0xa0   : > { %v877_v52 = vmul.f32 %v845_v25, %v845_v25 }
  0xa2   : > { %v3297_v34 = vpop.permute.xlu1 %429  ;;  %v587_v35 = vpop.permute.xlu0 %586 }
  0xa3   : > { %2880 = vset.pattern.permute.xlu1 %v3089_v3  ;;  %v667_v7 = vsub.f32 %v587_v35, %v3328_v63  ;;  %v668_v8 = vsub.f32 %v587_v35, %v3330_v1 }
  0xa4   : > { %630 = vperm.xlu1 %2880, %v417_v23  }
  0xa5   : > { %v699_v20 = vmul.f32 %v667_v7, %v667_v7  ;;  %v700_v21 = vmul.f32 %v668_v8, %v668_v8 }
  0xa6   : > { %v595_v36 = vpop.permute.xlu0 %594 }
  0xa7   : > { %v3300_v37 = vpop.permute.xlu1 %590  ;;  %v671_v14 = vsub.f32 %v595_v36, %v3328_v63  ;;  %v672_v15 = vsub.f32 %v595_v36, %v3330_v1 }
  0xa8   : > { %2881 = vset.pattern.permute.xlu1 %v3088_v0 }
  0xa9   : > { %808 = vperm.xlu1 %2881, %v417_v23   ;;  %v703_v27 = vmul.f32 %v671_v14, %v671_v14  ;;  %v704_v41 = vmul.f32 %v672_v15, %v672_v15 }
  0xaa   : > { %v3303_v38 = vpop.permute.xlu0 %602 }
  0xac   : > { %v3305_v39 = vpop.permute.xlu1 %959 }
  0xad   : > { %2882 = vset.pattern.permute.xlu1 %v3090_v4  ;;  %vm1014_vm0 = vcmp.eq.s32.totalorder %v3305_v39, %v3351_v16  ;;  %vm1015_vm1 = vcmp.eq.s32.totalorder %v3305_v39, %v3361_v29 }
  0xae   : > { %484 = vperm.xlu1 %2882, %v3235_v11   ;;  %v3309_v40 = vpop.permute.xlu0 %610 }
  0xb0   : > { %v435_v42 = vpop.permute.xlu1 %434 }
  0xb1   : > { %v526_v18 = vsub.f32 %v435_v42, %v3345_v12 }
  0xb2   : > { %2883 = vset.pattern.permute.xlu1 %v3088_v0  ;;  %v3312_v43 = vpop.permute.xlu0 %618 }
  0xb3   : > { %812 = vperm.xlu1 %2883, %v3235_v11   ;;  %v3343_v11 = vrot.slane %v506_v61, %v505_v53  ;;  %v558_v44 = vmul.f32 %v526_v18, %v526_v18 }
  0xb5   : > { %v773_v45 = vpop.permute.xlu1 %772  ;;  %v525_v17 = vsub.f32 %v435_v42, %v3343_v11  ;;  %v736_v8 = vadd.f32 %v704_v41, %v558_v44 }
  0xb6   : > { %v3316_v49 = vpop.permute.xlu0 %626  ;;  %v849_v30 = vsub.f32 %v773_v45, %v3334_v6  ;;  %v850_v31 = vsub.f32 %v773_v45, %v3341_v10 }
  0xb7   : > { %2884 = vset.pattern.permute.xlu1 %v3090_v4  ;;  %v557_v42 = vmul.f32 %v525_v17, %v525_v17 }
  0xb8   : > { %992 = vperm.xlu1 %2884, %v952_v46   ;;  %v881_v54 = vmul.f32 %v849_v30, %v849_v30  ;;  %v882_v55 = vmul.f32 %v850_v31, %v850_v31 }
  0xb9   : > { %v735_v59 = vadd.f32 %v703_v27, %v557_v42 }
  0xba   : > { %v3322_v57 = vpop.permute.xlu1 %962  ;;  %v3324_v58 = vpop.permute.xlu0 %634 }
  0xbb   : > { %vm1016_vm8 = vcmp.eq.s32.totalorder %v3322_v57, %v3351_v16  ;;  %vm1017_vm9 = vcmp.eq.s32.totalorder %v3322_v57, %v3361_v29 }
  0xbc   : > { %2885 = vset.pattern.permute.xlu1 %v3089_v3 }
  0xbd   : > { %638 = vperm.xlu1 %2885, %v3268_v26  }
  0xbe   : > { %v3332_v2 = vpop.permute.xlu0 %642 }
  0xbf   : > { %v599_v5 = vpop.permute.xlu1 %598 }
  0xc0   : > { %v673_v46 = vsub.f32 %v599_v5, %v3328_v63  ;;  %v674_v56 = vsub.f32 %v599_v5, %v3330_v1 }
  0xc1   : > { %2886 = vset.pattern.permute.xlu1 %v3088_v0 }
  0xc2   : > { %816 = vperm.xlu1 %2886, %v3268_v26   ;;  %v846_v26 = vsub.f32 %v3292_v32, %v3341_v10  ;;  %v705_v9 = vmul.f32 %v673_v46, %v673_v46  ;;  %v706_v18 = vmul.f32 %v674_v56, %v674_v56 }
  0xc3   : > { %v425_v19 = vpop.permute.xlu0 %424 }
  0xc4   : > { %v521_v22 = vsub.f32 %v425_v19, %v3343_v11  ;;  %v522_v23 = vsub.f32 %v425_v19, %v3345_v12  ;;  %v777_v24 = vpop.permute.xlu1 %776  ;;  %v878_v45 = vmul.f32 %v846_v26, %v846_v26 }
  0xc5   : > { %v851_v14 = vsub.f32 %v777_v24, %v3334_v6  ;;  %v852_v19 = vsub.f32 %v777_v24, %v3341_v10 }
  0xc6   : > { %v553_v35 = vmul.f32 %v521_v22, %v521_v22  ;;  %v554_v36 = vmul.f32 %v522_v23, %v522_v23  ;;  %2887 = vset.pattern.permute.xlu1 %v3090_v4  ;;  %v954_v22 = vld [vmem:[%s3219_s12 + $0x68] sm:$0xff] }
  0xc7   : > { %v440_v48 = vpop.permute.xlu0 %439  ;;  %494 = vperm.xlu1 %2887, %v3241_v13   ;;  %v883_v39 = vmul.f32 %v851_v14, %v851_v14  ;;  %v884_v24 = vmul.f32 %v852_v19, %v852_v19 }
  0xc8   : > { %v731_v32 = vadd.f32 %v699_v20, %v553_v35  ;;  %v732_v50 = vadd.f32 %v700_v21, %v554_v36  ;;  %v527_v47 = vsub.f32 %v440_v48, %v3343_v11  ;;  %v528_v51 = vsub.f32 %v440_v48, %v3345_v12 }
  0xc9   : > { %v3372_v53 = vpop.permute.xlu1 %444  ;;  %v913_v20 = vadd.f32 %v881_v54, %v735_v59  ;;  %v914_v21 = vadd.f32 %v882_v55, %v736_v8  ;;  %v669_v8 = vsub.f32 %v3300_v37, %v3328_v63 }
  0xca   : > { %v559_v60 = vmul.f32 %v527_v47, %v527_v47  ;;  %v909_v62 = vadd.f32 %v877_v52, %v731_v32  ;;  %v910_v7 = vadd.f32 %v878_v45, %v732_v50  ;;  %v560_v15 = vmul.f32 %v528_v51, %v528_v51  ;;  %v956_v50 = vld [vmem:[%s3219_s12 + $0x78] sm:$0xff]  ;;  %s4921_s12 = scalar_lea.hbm %s4980_s10, %s2514_s28 }
  0xcb   : > { %v966_v61 = vpop.permute.xlu0 %965  ;;  %2889 = vset.pattern.permute.xlu1 %v3088_v0 }
  0xcc   : > { %820 = vperm.xlu1 %2889, %v3241_v13   ;;  %vm1018_vm2 = vcmp.eq.s32.totalorder %v966_v61, %v3351_v16  ;;  %vm1019_vm3 = vcmp.eq.s32.totalorder %v966_v61, %v3361_v29  ;;  %v3385_v5 = vsel %vm1014_vm0, %v909_v62, 1e+30  ;;  %v3390_v17 = vsel %vm1015_vm1, %v910_v7, 1e+30 }
  0xcd   : > { %v737_v23 = vadd.f32 %v705_v9, %v559_v60  ;;  %v1078_v25 = vmin.f32 %v3385_v5, %v3390_v17  ;;  %v738_v26 = vadd.f32 %v706_v18, %v560_v15  ;;  %v3398_v27 = vsel %vm1018_vm2, %v913_v20, 1e+30 }
  0xce   : > { %v3393_v13 = vpop.permute.xlu1 %780  ;;  %v3400_v30 = vsel %vm1019_vm3, %v914_v21, 1e+30  ;;  %v670_v9 = vsub.f32 %v3300_v37, %v3330_v1  ;;  %v523_v15 = vsub.f32 %v3297_v34, %v3343_v11  ;;  %v524_v20 = vsub.f32 %v3297_v34, %v3345_v12 }
  0xcf   : > { %1079 = vmin.xlane.f32.xlu0 %v1078_v25  ;;  %v1084_v31 = vmin.f32 %v3398_v27, %v3400_v30  ;;  %v915_v36 = vadd.f32 %v883_v39, %v737_v23  ;;  %v916_v41 = vadd.f32 %v884_v24, %v738_v26  ;;  %v848_v37 = vsub.f32 %v3294_v33, %v3341_v10 }
  0xd0   : > { %2890 = vset.pattern.permute.xlu1 %v3090_v4  ;;  %v701_v25 = vmul.f32 %v669_v8, %v669_v8  ;;  %v702_v26 = vmul.f32 %v670_v9, %v670_v9  ;;  %v675_v34 = vsub.f32 %v3303_v38, %v3328_v63  ;;  %v529_v24 = vsub.f32 %v3372_v53, %v3343_v11 }
  0xd1   : > { %998 = vperm.xlu1 %2890, %v954_v22   ;;  %v847_v22 = vsub.f32 %v3294_v33, %v3334_v6  ;;  %v676_v33 = vsub.f32 %v3303_v38, %v3330_v1  ;;  %v680_v38 = vsub.f32 %v3309_v40, %v3330_v1 }
  0xd3   : > { %v969_v35 = vpop.permute.xlu1 %968  ;;  %1085 = vmin.xlane.f32.xlu0 %v1084_v31 }
  0xd4   : > { %vm1020_vm4 = vcmp.eq.s32.totalorder %v969_v35, %v3351_v16  ;;  %vm1021_vm5 = vcmp.eq.s32.totalorder %v969_v35, %v3361_v29  ;;  %v555_v35 = vmul.f32 %v523_v15, %v523_v15 }
  0xd5   : > { %2891 = vset.pattern.permute.xlu1 %v3089_v3  ;;  %v3408_v42 = vsel %vm1020_vm4, %v915_v36, 1e+30  ;;  %v3411_v44 = vsel %vm1021_vm5, %v916_v41, 1e+30  ;;  %v450_v3 = vpop.permute.xlu0 %449  ;;  %v556_v36 = vmul.f32 %v524_v20, %v524_v20 }
  0xd6   : > { %646 = vperm.xlu1 %2891, %v3274_v28   ;;  %v1087_v46 = vmin.f32 %v3408_v42, %v3411_v44  ;;  %v531_v47 = vsub.f32 %v450_v3, %v3343_v11  ;;  %v532_v45 = vsub.f32 %v450_v3, %v3345_v12  ;;  %v853_v3 = vsub.f32 %v3393_v13, %v3334_v6 }
  0xd8   : > { %v607_v48 = vpop.permute.xlu1 %606  ;;  %1088 = vmin.xlane.f32.xlu0 %v1087_v46  ;;  %v563_v55 = vmul.f32 %v531_v47, %v531_v47  ;;  %v564_v59 = vmul.f32 %v532_v45, %v532_v45  ;;  %v733_v47 = vadd.f32 %v701_v25, %v555_v35  ;;  %v679_v45 = vsub.f32 %v3309_v40, %v3328_v63 }
  0xd9   : > { %v677_v51 = vsub.f32 %v607_v48, %v3328_v63  ;;  %v678_v54 = vsub.f32 %v607_v48, %v3330_v1  ;;  %v3455_v41 = vpop.permute.xlu0 %971  ;;  %v879_v48 = vmul.f32 %v847_v22, %v847_v22 }
  0xda   : > { %2892 = vset.pattern.permute.xlu1 %v3088_v0  ;;  %vm1022_vm10 = vcmp.eq.s32.totalorder %v3455_v41, %v3351_v16  ;;  %vm1023_vm11 = vcmp.eq.s32.totalorder %v3455_v41, %v3361_v29 }
  0xdb   : > { %824 = vperm.xlu1 %2892, %v3274_v28   ;;  %v709_v56 = vmul.f32 %v677_v51, %v677_v51  ;;  %v734_v51 = vadd.f32 %v702_v26, %v556_v36  ;;  %v911_v8 = vadd.f32 %v879_v48, %v733_v47 }
  0xdd   : > { %v785_v32 = vpop.permute.xlu1 %784  ;;  %v741_v7 = vadd.f32 %v709_v56, %v563_v55  ;;  %v708_v55 = vmul.f32 %v676_v33, %v676_v33  ;;  %v854_v56 = vsub.f32 %v3393_v13, %v3341_v10  ;;  %v3479_v20 = vsel %vm1016_vm8, %v911_v8, 1e+30 }
  0xde   : > { %v855_v0 = vsub.f32 %v785_v32, %v3334_v6  ;;  %v856_v28 = vsub.f32 %v785_v32, %v3341_v10  ;;  %v880_v32 = vmul.f32 %v848_v37, %v848_v37 }
  0xdf   : > { %2893 = vset.pattern.permute.xlu1 %v3090_v4  ;;  %v710_v4 = vmul.f32 %v678_v54, %v678_v54  ;;  %v707_v54 = vmul.f32 %v675_v34, %v675_v34 }
  0xe0   : > { %1004 = vperm.xlu1 %2893, %v956_v50   ;;  %v887_v61 = vmul.f32 %v855_v0, %v855_v0  ;;  %v888_v62 = vmul.f32 %v856_v28, %v856_v28  ;;  %v530_v50 = vsub.f32 %v3372_v53, %v3345_v12  ;;  %v683_v0 = vsub.f32 %v3312_v43, %v3328_v63 }
  0xe1   : > { %v742_v14 = vadd.f32 %v710_v4, %v564_v59  ;;  %v561_v28 = vmul.f32 %v529_v24, %v529_v24  ;;  %v684_v53 = vsub.f32 %v3312_v43, %v3330_v1  ;;  %v460_v59 = vpop.permute.xlu0 %459  ;;  %v885_v4 = vmul.f32 %v853_v3, %v853_v3 }
  0xe2   : > { %v3421_v52 = vpop.permute.xlu1 %454  ;;  %v919_v19 = vadd.f32 %v887_v61, %v741_v7  ;;  %v562_v40 = vmul.f32 %v530_v50, %v530_v50  ;;  %v712_v7 = vmul.f32 %v680_v38, %v680_v38  ;;  %v912_v9 = vadd.f32 %v880_v32, %v734_v51 }
  0xe3   : > { %v920_v21 = vadd.f32 %v888_v62, %v742_v14  ;;  %v711_v62 = vmul.f32 %v679_v45, %v679_v45  ;;  %v715_v14 = vmul.f32 %v683_v0, %v683_v0  ;;  %v739_v15 = vadd.f32 %v707_v54, %v561_v28 }
  0xe4   : > { %v533_v43 = vsub.f32 %v3421_v52, %v3343_v11  ;;  %v534_v13 = vsub.f32 %v3421_v52, %v3345_v12  ;;  %v3481_v57 = vsel %vm1017_vm9, %v912_v9, 1e+30  ;;  %v535_v26 = vsub.f32 %v460_v59, %v3343_v11 }
  0xe5   : > { %v917_v22 = vadd.f32 %v885_v4, %v739_v15  ;;  %v536_v52 = vsub.f32 %v460_v59, %v3345_v12  ;;  %v978_v34 = vpop.permute.xlu0 %977 }
  0xe6   : > { %v565_v35 = vmul.f32 %v533_v43, %v533_v43  ;;  %v566_v36 = vmul.f32 %v534_v13, %v534_v13  ;;  %v567_v38 = vmul.f32 %v535_v26, %v535_v26  ;;  %vm1026_vm12 = vcmp.eq.s32.totalorder %v978_v34, %v3351_v16 }
  0xe7   : > { %v3427_v60 = vpop.permute.xlu1 %788  ;;  %v3503_v47 = vsel %vm1022_vm10, %v917_v22, 1e+30  ;;  %v568_v54 = vmul.f32 %v536_v52, %v536_v52  ;;  %vm1027_vm13 = vcmp.eq.s32.totalorder %v978_v34, %v3361_v29 }
  0xe8   : > { %v857_v37 = vsub.f32 %v3427_v60, %v3334_v6  ;;  %v858_v25 = vsub.f32 %v3427_v60, %v3341_v10  ;;  %v1081_v60 = vmin.f32 %v3479_v20, %v3481_v57 }
  0xe9   : > { %v470_v28 = vpop.permute.xlu0 %469 }
  0xea   : > { %v889_v51 = vmul.f32 %v857_v37, %v857_v37  ;;  %v890_v45 = vmul.f32 %v858_v25, %v858_v25 }
  0xec   : > { %v975_v18 = vpop.permute.xlu1 %974 }
  0xed   : > { %vm1024_vm6 = vcmp.eq.s32.totalorder %v975_v18, %v3351_v16  ;;  %vm1025_vm7 = vcmp.eq.s32.totalorder %v975_v18, %v3361_v29  ;;  %v716_v18 = vmul.f32 %v684_v53, %v684_v53  ;;  %v744_v53 = vadd.f32 %v712_v7, %v566_v36  ;;  %v984_v26 = vpop.permute.xlu0 %983 }
  0xee   : > { %v3443_v23 = vsel %vm1024_vm6, %v919_v19, 1e+30  ;;  %v3445_v39 = vsel %vm1025_vm7, %v920_v21, 1e+30  ;;  %v886_v19 = vmul.f32 %v854_v56, %v854_v56  ;;  %v740_v21 = vadd.f32 %v708_v55, %v562_v40 }
  0xef   : > { %v1093_v31 = vmin.f32 %v3443_v23, %v3445_v39  ;;  %v743_v55 = vadd.f32 %v711_v62, %v565_v35  ;;  %v922_v62 = vadd.f32 %v890_v45, %v744_v53  ;;  %vm1030_vm0 = vcmp.eq.s32.totalorder %v984_v26, %v3351_v16 }
  0xf0   : > { %v918_v32 = vadd.f32 %v886_v19, %v740_v21  ;;  %vm1031_vm1 = vcmp.eq.s32.totalorder %v984_v26, %v3361_v29  ;;  %v539_v45 = vsub.f32 %v470_v28, %v3343_v11  ;;  %v687_v53 = vsub.f32 %v3316_v49, %v3328_v63 }
  0xf1   : > { %v615_v46 = vpop.permute.xlu1 %614  ;;  %1094 = vmin.xlane.f32.xlu0 %v1093_v31  ;;  %v921_v43 = vadd.f32 %v889_v51, %v743_v55  ;;  %v3521_v36 = vsel %vm1027_vm13, %v922_v62, 1e+30 }
  0xf2   : > { %v681_v24 = vsub.f32 %v615_v46, %v3328_v63  ;;  %v682_v33 = vsub.f32 %v615_v46, %v3330_v1 }
  0xf4   : > { %v713_v0 = vmul.f32 %v681_v24, %v681_v24  ;;  %v714_v56 = vmul.f32 %v682_v33, %v682_v33 }
  0xf6   : > { %v793_v61 = vpop.permute.xlu1 %792  ;;  %v745_v7 = vadd.f32 %v713_v0, %v567_v38  ;;  %v746_v22 = vadd.f32 %v714_v56, %v568_v54  ;;  %v540_v38 = vsub.f32 %v470_v28, %v3345_v12  ;;  %v688_v56 = vsub.f32 %v3316_v49, %v3330_v1 }
  0xf7   : > { %v859_v48 = vsub.f32 %v793_v61, %v3334_v6  ;;  %v860_v46 = vsub.f32 %v793_v61, %v3341_v10  ;;  %v3511_v61 = vsel %vm1023_vm11, %v918_v32, 1e+30  ;;  %v571_v28 = vmul.f32 %v539_v45, %v539_v45 }
  0xf8   : > { %v1090_v41 = vmin.f32 %v3503_v47, %v3511_v61 }
  0xf9   : > { %v891_v59 = vmul.f32 %v859_v48, %v859_v48  ;;  %v892_v13 = vmul.f32 %v860_v46, %v860_v46 }
  0xfb   : > { %v465_v31 = vpop.permute.xlu1 %464  ;;  %v923_v24 = vadd.f32 %v891_v59, %v745_v7  ;;  %v924_v35 = vadd.f32 %v892_v13, %v746_v22  ;;  %v480_v13 = vpop.permute.xlu0 %479 }
  0xfc   : > { %v537_v50 = vsub.f32 %v465_v31, %v3343_v11  ;;  %v538_v3 = vsub.f32 %v465_v31, %v3345_v12  ;;  %v3517_v31 = vsel %vm1026_vm12, %v921_v43, 1e+30 }
  0xfe   : > { %v569_v4 = vmul.f32 %v537_v50, %v537_v50  ;;  %v570_v8 = vmul.f32 %v538_v3, %v538_v3  ;;  %v1096_v50 = vmin.f32 %v3517_v31, %v3521_v36 }
 0x100   : > { %v797_v40 = vpop.permute.xlu1 %796  ;;  %v747_v37 = vadd.f32 %v715_v14, %v569_v4  ;;  %v748_v25 = vadd.f32 %v716_v18, %v570_v8 }
 0x101   : > { %v861_v9 = vsub.f32 %v797_v40, %v3334_v6  ;;  %v862_v15 = vsub.f32 %v797_v40, %v3341_v10 }
 0x103   : > { %v893_v19 = vmul.f32 %v861_v9, %v861_v9  ;;  %v894_v21 = vmul.f32 %v862_v15, %v862_v15  ;;  %v572_v9 = vmul.f32 %v540_v38, %v540_v38 }
 0x104   : > { %1082 = vmin.xlane.f32.xlu1 %v1081_v60 }
 0x105   : > { %v981_v52 = vpop.permute.xlu1 %980  ;;  %v925_v34 = vadd.f32 %v893_v19, %v747_v37  ;;  %v926_v33 = vadd.f32 %v894_v21, %v748_v25  ;;  %v719_v19 = vmul.f32 %v687_v53, %v687_v53  ;;  %v720_v21 = vmul.f32 %v688_v56, %v688_v56 }
 0x106   : > { %vm1028_vm14 = vcmp.eq.s32.totalorder %v981_v52, %v3351_v16  ;;  %vm1029_vm15 = vcmp.eq.s32.totalorder %v981_v52, %v3361_v29 }
 0x107   : > { %v3523_v48 = vsel %vm1028_vm14, %v923_v24, 1e+30  ;;  %v3527_v14 = vsel %vm1029_vm15, %v924_v35, 1e+30  ;;  %v3533_v3 = vsel %vm1030_vm0, %v925_v34, 1e+30 }
 0x108   : > { %1091 = vmin.xlane.f32.xlu1 %v1090_v41  ;;  %v1099_v18 = vmin.f32 %v3523_v48, %v3527_v14  ;;  %v3535_v60 = vsel %vm1031_vm1, %v926_v33, 1e+30 }
 0x109   : > { %v1102_v51 = vmin.f32 %v3533_v3, %v3535_v60 }
 0x10a   : > { %v623_v32 = vpop.permute.xlu1 %622  ;;  %1100 = vmin.xlane.f32.xlu0 %v1099_v18  ;;  %v990_v18 = vpop.permute.xlu0 %989 }
 0x10b   : > { %v685_v54 = vsub.f32 %v623_v32, %v3328_v63  ;;  %v686_v0 = vsub.f32 %v623_v32, %v3330_v1  ;;  %vm1034_vm2 = vcmp.eq.s32.totalorder %v990_v18, %v3351_v16  ;;  %vm1035_vm5 = vcmp.eq.s32.totalorder %v990_v18, %v3361_v29 }
 0x10c   : > { %1097 = vmin.xlane.f32.xlu1 %v1096_v50 }
 0x10d   : > { %v717_v15 = vmul.f32 %v685_v54, %v685_v54  ;;  %v718_v43 = vmul.f32 %v686_v0, %v686_v0 }
 0x10f   : > { %v801_v46 = vpop.permute.xlu1 %800  ;;  %v749_v52 = vadd.f32 %v717_v15, %v571_v28  ;;  %v750_v41 = vadd.f32 %v718_v43, %v572_v9  ;;  %v691_v28 = vsub.f32 %v3324_v58, %v3328_v63  ;;  %v692_v9 = vsub.f32 %v3324_v58, %v3330_v1 }
 0x110   : > { %1103 = vmin.xlane.f32.xlu1 %v1102_v51  ;;  %v863_v4 = vsub.f32 %v801_v46, %v3334_v6  ;;  %v864_v8 = vsub.f32 %v801_v46, %v3341_v10  ;;  %v543_v43 = vsub.f32 %v480_v13, %v3343_v11 }
 0x111   : > { %v724_v58 = vmul.f32 %v692_v9, %v692_v9 }
 0x112   : > { %v895_v37 = vmul.f32 %v863_v4, %v863_v4  ;;  %v896_v49 = vmul.f32 %v864_v8, %v864_v8 }
 0x114   : > { %v475_v55 = vpop.permute.xlu1 %474  ;;  %v927_v32 = vadd.f32 %v895_v37, %v749_v52  ;;  %v928_v50 = vadd.f32 %v896_v49, %v750_v41  ;;  %v723_v41 = vmul.f32 %v691_v28, %v691_v28 }
 0x115   : > { %v541_v59 = vsub.f32 %v475_v55, %v3343_v11  ;;  %v542_v40 = vsub.f32 %v475_v55, %v3345_v12 }
 0x117   : > { %v573_v62 = vmul.f32 %v541_v59, %v541_v59  ;;  %v574_v7 = vmul.f32 %v542_v40, %v542_v40 }
 0x119   : > { %v805_v22 = vpop.permute.xlu1 %804  ;;  %v751_v24 = vadd.f32 %v719_v19, %v573_v62  ;;  %v752_v35 = vadd.f32 %v720_v21, %v574_v7  ;;  %v544_v62 = vsub.f32 %v480_v13, %v3345_v12 }
 0x11a   : > { %v865_v25 = vsub.f32 %v805_v22, %v3334_v6  ;;  %v866_v26 = vsub.f32 %v805_v22, %v3341_v10 }
 0x11c   : > { %v897_v34 = vmul.f32 %v865_v25, %v865_v25  ;;  %v898_v33 = vmul.f32 %v866_v26, %v866_v26  ;;  %v490_v25 = vpop.permute.xlu0 %489 }
 0x11e   : > { %v987_v51 = vpop.permute.xlu1 %986  ;;  %v929_v46 = vadd.f32 %v897_v34, %v751_v24  ;;  %v930_v45 = vadd.f32 %v898_v33, %v752_v35  ;;  %v575_v24 = vmul.f32 %v543_v43, %v543_v43  ;;  %v576_v35 = vmul.f32 %v544_v62, %v544_v62 }
 0x11f   : > { %vm1032_vm3 = vcmp.eq.s32.totalorder %v987_v51, %v3351_v16  ;;  %vm1033_vm4 = vcmp.eq.s32.totalorder %v987_v51, %v3361_v29 }
 0x120   : > { %v3557_v38 = vsel %vm1032_vm3, %v927_v32, 1e+30  ;;  %v3559_v54 = vsel %vm1033_vm4, %v928_v50, 1e+30  ;;  %v3561_v0 = vsel %vm1034_vm2, %v929_v46, 1e+30 }
 0x121   : > { %v3563_v55 = vsel %vm1035_vm5, %v930_v45, 1e+30  ;;  %v1105_v53 = vmin.f32 %v3557_v38, %v3559_v54 }
 0x122   : > { %v1108_v56 = vmin.f32 %v3561_v0, %v3563_v55 }
 0x123   : > { %1106 = vmin.xlane.f32.xlu0 %v1105_v53  ;;  %v631_v59 = vpop.permute.xlu1 %630 }
 0x124   : > { %1109 = vmin.xlane.f32.xlu1 %v1108_v56  ;;  %v689_v4 = vsub.f32 %v631_v59, %v3328_v63  ;;  %v690_v8 = vsub.f32 %v631_v59, %v3330_v1  ;;  %v996_v59 = vpop.permute.xlu0 %995 }
 0x125   : > { %vm1038_vm6 = vcmp.eq.s32.totalorder %v996_v59, %v3351_v16  ;;  %vm1039_vm9 = vcmp.eq.s32.totalorder %v996_v59, %v3361_v29 }
 0x126   : > { %v721_v37 = vmul.f32 %v689_v4, %v689_v4  ;;  %v722_v49 = vmul.f32 %v690_v8, %v690_v8 }
 0x128   : > { %v809_v40 = vpop.permute.xlu1 %808  ;;  %v753_v50 = vadd.f32 %v721_v37, %v575_v24  ;;  %v754_v51 = vadd.f32 %v722_v49, %v576_v35  ;;  %v547_v24 = vsub.f32 %v490_v25, %v3343_v11  ;;  %v548_v35 = vsub.f32 %v490_v25, %v3345_v12 }
 0x129   : > { %v867_v21 = vsub.f32 %v809_v40, %v3334_v6  ;;  %v868_v22 = vsub.f32 %v809_v40, %v3341_v10 }
 0x12a   : > { %v580_v59 = vmul.f32 %v548_v35, %v548_v35 }
 0x12b   : > { %v899_v33 = vmul.f32 %v867_v21, %v867_v21  ;;  %v900_v13 = vmul.f32 %v868_v22, %v868_v22 }
 0x12d   : > { %v485_v15 = vpop.permute.xlu1 %484  ;;  %v931_v40 = vadd.f32 %v899_v33, %v753_v50  ;;  %v932_v4 = vadd.f32 %v900_v13, %v754_v51  ;;  %v500_v13 = vpop.permute.xlu0 %499 }
 0x12e   : > { %v545_v7 = vsub.f32 %v485_v15, %v3343_v11  ;;  %v546_v19 = vsub.f32 %v485_v15, %v3345_v12 }
 0x130   : > { %v577_v26 = vmul.f32 %v545_v7, %v545_v7  ;;  %v578_v52 = vmul.f32 %v546_v19, %v546_v19 }
 0x132   : > { %v813_v34 = vpop.permute.xlu1 %812  ;;  %v755_v46 = vadd.f32 %v723_v41, %v577_v26  ;;  %v756_v45 = vadd.f32 %v724_v58, %v578_v52  ;;  %v695_v52 = vsub.f32 %v3332_v2, %v3328_v63  ;;  %v696_v41 = vsub.f32 %v3332_v2, %v3330_v1 }
 0x133   : > { %v869_v18 = vsub.f32 %v813_v34, %v3334_v6  ;;  %v870_v32 = vsub.f32 %v813_v34, %v3341_v10 }
 0x134   : > { %v728_v2 = vmul.f32 %v696_v41, %v696_v41 }
 0x135   : > { %v901_v53 = vmul.f32 %v869_v18, %v869_v18  ;;  %v902_v56 = vmul.f32 %v870_v32, %v870_v32 }
 0x137   : > { %v933_v8 = vadd.f32 %v901_v53, %v755_v46  ;;  %v934_v28 = vadd.f32 %v902_v56, %v756_v45  ;;  %v993_v9 = vpop.permute.xlu1 %992  ;;  %v727_v53 = vmul.f32 %v695_v52, %v695_v52  ;;  %v579_v56 = vmul.f32 %v547_v24, %v547_v24 }
 0x138   : > { %vm1036_vm7 = vcmp.eq.s32.totalorder %v993_v9, %v3351_v16  ;;  %vm1037_vm8 = vcmp.eq.s32.totalorder %v993_v9, %v3361_v29 }
 0x139   : > { %v3587_v15 = vsel %vm1036_vm7, %v931_v40, 1e+30  ;;  %v3589_v43 = vsel %vm1037_vm8, %v932_v4, 1e+30  ;;  %v3591_v62 = vsel %vm1038_vm6, %v933_v8, 1e+30 }
 0x13a   : > { %v3593_v7 = vsel %vm1039_vm9, %v934_v28, 1e+30  ;;  %v1111_v19 = vmin.f32 %v3587_v15, %v3589_v43 }
 0x13b   : > { %v1114_v21 = vmin.f32 %v3591_v62, %v3593_v7 }
 0x13c   : > { %1112 = vmin.xlane.f32.xlu0 %v1111_v19  ;;  %v639_v22 = vpop.permute.xlu1 %638 }
 0x13d   : > { %1115 = vmin.xlane.f32.xlu1 %v1114_v21  ;;  %v693_v49 = vsub.f32 %v639_v22, %v3328_v63  ;;  %v694_v26 = vsub.f32 %v639_v22, %v3330_v1  ;;  %v1002_v21 = vpop.permute.xlu0 %1001 }
 0x13e   : > { %vm1042_vm10 = vcmp.eq.s32.totalorder %v1002_v21, %v3351_v16  ;;  %vm1043_vm13 = vcmp.eq.s32.totalorder %v1002_v21, %v3361_v29 }
 0x13f   : > { %v725_v50 = vmul.f32 %v693_v49, %v693_v49  ;;  %v726_v51 = vmul.f32 %v694_v26, %v694_v26 }
 0x141   : > { %v817_v37 = vpop.permute.xlu1 %816  ;;  %v757_v9 = vadd.f32 %v725_v50, %v579_v56  ;;  %v758_v19 = vadd.f32 %v726_v51, %v580_v59  ;;  %v552_v56 = vsub.f32 %v500_v13, %v3345_v12 }
 0x142   : > { %v871_v18 = vsub.f32 %v817_v37, %v3334_v6  ;;  %v872_v32 = vsub.f32 %v817_v37, %v3341_v10 }
 0x144   : > { %v903_v4 = vmul.f32 %v871_v18, %v871_v18  ;;  %v904_v25 = vmul.f32 %v872_v32, %v872_v32 }
 0x146   : > { %v495_v58 = vpop.permute.xlu1 %494 }
 0x147   : > { %v549_v34 = vsub.f32 %v495_v58, %v3343_v11  ;;  %v550_v33 = vsub.f32 %v495_v58, %v3345_v12  ;;  %v935_v58 = vadd.f32 %v903_v4, %v757_v9 }
 0x149   : > { %v581_v46 = vmul.f32 %v549_v34, %v549_v34  ;;  %v582_v45 = vmul.f32 %v550_v33, %v550_v33  ;;  %v936_v34 = vadd.f32 %v904_v25, %v758_v19 }
 0x14b   : > { %v821_v40 = vpop.permute.xlu1 %820  ;;  %v759_v22 = vadd.f32 %v727_v53, %v581_v46  ;;  %v760_v37 = vadd.f32 %v728_v2, %v582_v45  ;;  %v551_v2 = vsub.f32 %v500_v13, %v3343_v11 }
 0x14c   : > { %v873_v8 = vsub.f32 %v821_v40, %v3334_v6  ;;  %v874_v28 = vsub.f32 %v821_v40, %v3341_v10 }
 0x14d   : > { %v583_v25 = vmul.f32 %v551_v2, %v551_v2 }
 0x14e   : > { %v905_v49 = vmul.f32 %v873_v8, %v873_v8  ;;  %v906_v26 = vmul.f32 %v874_v28, %v874_v28  ;;  %v584_v8 = vmul.f32 %v552_v56, %v552_v56 }
 0x150   : > { %v937_v52 = vadd.f32 %v905_v49, %v759_v22  ;;  %v938_v41 = vadd.f32 %v906_v26, %v760_v37  ;;  %v999_v24 = vpop.permute.xlu1 %998 }
 0x151   : > { %vm1040_vm11 = vcmp.eq.s32.totalorder %v999_v24, %v3351_v16  ;;  %vm1041_vm12 = vcmp.eq.s32.totalorder %v999_v24, %v3361_v29 }
 0x152   : > { %v3617_v35 = vsel %vm1040_vm11, %v935_v58, 1e+30  ;;  %v3619_v33 = vsel %vm1041_vm12, %v936_v34, 1e+30  ;;  %v3621_v18 = vsel %vm1042_vm10, %v937_v52, 1e+30 }
 0x153   : > { %v3623_v32 = vsel %vm1043_vm13, %v938_v41, 1e+30  ;;  %v1117_v50 = vmin.f32 %v3617_v35, %v3619_v33 }
 0x154   : > { %v1120_v51 = vmin.f32 %v3621_v18, %v3623_v32 }
 0x155   : > { %1118 = vmin.xlane.f32.xlu0 %v1117_v50  ;;  %v647_v46 = vpop.permute.xlu1 %646 }
 0x156   : > { %1121 = vmin.xlane.f32.xlu1 %v1120_v51  ;;  %v697_v45 = vsub.f32 %v647_v46, %v3328_v63  ;;  %v698_v53 = vsub.f32 %v647_v46, %v3330_v1 }
 0x158   : > { %v729_v59 = vmul.f32 %v697_v45, %v697_v45  ;;  %v730_v40 = vmul.f32 %v698_v53, %v698_v53 }
 0x15a   : > { %v825_v4 = vpop.permute.xlu1 %824  ;;  %v761_v19 = vadd.f32 %v729_v59, %v583_v25  ;;  %v762_v21 = vadd.f32 %v730_v40, %v584_v8 }
 0x15b   : > { %v875_v28 = vsub.f32 %v825_v4, %v3334_v6  ;;  %v876_v9 = vsub.f32 %v825_v4, %v3341_v10 }
 0x15c   : > { %v1080_v63 = vpop.xlane.xlu0 %1079 }
 0x15d   : > { %v907_v22 = vmul.f32 %v875_v28, %v875_v28  ;;  %v908_v37 = vmul.f32 %v876_v9, %v876_v9  ;;  %v3635_v26 = vmax.f32 %v1080_v63, 1e-16  ;;  %vm1142_vm14 = vcmp.eq.f32.partialorder %v3385_v5, %v1080_v63 }
 0x15e   : > { %vm1143_vm15 = vcmp.eq.f32.partialorder %v3390_v17, %v1080_v63  ;;  %v3644_v6 = vsel %vm1142_vm14, 1e+30, %v3385_v5 }
 0x15f   : > { %v939_v49 = vadd.f32 %v907_v22, %v761_v19  ;;  %v940_v1 = vadd.f32 %v908_v37, %v762_v21  ;;  %v1005_v11 = vpop.permute.xlu1 %1004  ;;  %2896 = vrcp.f32 %v3635_v26  ;;  %v3654_v13 = vsel %vm1143_vm15, 1e+30, %v3390_v17 }
 0x160   : > { %vm1044_vm0 = vcmp.eq.s32.totalorder %v1005_v11, %v3351_v16  ;;  %vm1045_vm1 = vcmp.eq.s32.totalorder %v1005_v11, %v3361_v29  ;;  %v1086_v58 = vpop.xlane.xlu0 %1085  ;;  %v1270_v16 = vmin.f32 %v3644_v6, %v3654_v13 }
 0x161   : > { %v3647_v10 = vsel %vm1044_vm0, %v939_v49, 1e+30  ;;  %v3649_v12 = vsel %vm1045_vm1, %v940_v1, 1e+30  ;;  %v3660_v34 = vmax.f32 %v1086_v58, 1e-16  ;;  %vm1146_vm2 = vcmp.eq.f32.partialorder %v3398_v27, %v1086_v58 }
 0x162   : > { %v1123_v29 = vmin.f32 %v3647_v10, %v3649_v12  ;;  %vm1147_vm3 = vcmp.eq.f32.partialorder %v3400_v30, %v1086_v58  ;;  %1271 = vmin.xlane.f32.xlu1 %v1270_v16  ;;  %v3667_v52 = vsel %vm1146_vm2, 1e+30, %v3398_v27 }
 0x163   : > { %v3672_v41 = vsel %vm1147_vm3, 1e+30, %v3400_v30  ;;  %2898 = vrcp.f32 %v3660_v34 }
 0x164   : > { %1124 = vmin.xlane.f32.xlu0 %v1123_v29  ;;  %v1276_v24 = vmin.f32 %v3667_v52, %v3672_v41 }
 0x165   : > { %v1089_v50 = vpop.xlane.xlu0 %1088 }
 0x166   : > { %v3677_v51 = vmax.f32 %v1089_v50, 1e-16  ;;  %1277 = vmin.xlane.f32.xlu1 %v1276_v24  ;;  %vm1148_vm4 = vcmp.eq.f32.partialorder %v3408_v42, %v1089_v50  ;;  %vm1149_vm5 = vcmp.eq.f32.partialorder %v3411_v44, %v1089_v50 }
 0x167   : > { %v3743_v58 = vsel %vm1148_vm4, 1e+30, %v3408_v42  ;;  %v3748_v16 = vsel %vm1149_vm5, 1e+30, %v3411_v44 }
 0x168   : > { %5041 = vst [vmem:[#allocation5_spill] sm:$0xff] %v3677_v51  ;;  %2900 = vrcp.f32 %v3677_v51  ;;  %v1279_v50 = vmin.f32 %v3743_v58, %v3748_v16 }
 0x169   : > { %v2897_v46 = vpop.eup %2896 }
 0x16a   : > { %v1175_v45 = vmul.f32 %v2897_v46, %v3635_v26 }
 0x16c   : > { %v3683_v53 = vsel %vm1142_vm14, %v1175_v45, 0.0  ;;  %v3687_v2 = vsel %vm1143_vm15, %v1175_v45, 0.0 }
 0x16d   : > { %v2899_v56 = vpop.eup %2898 }
 0x16e   : > { %v1179_v59 = vmul.f32 %v2899_v56, %v3660_v34 }
 0x170   : > { %v3692_v40 = vsel %vm1146_vm2, %v1179_v59, 0.0  ;;  %v3696_v4 = vsel %vm1147_vm3, %v1179_v59, 0.0 }
 0x172   : > { %v2901_v25 = vpop.eup %2900 }
 0x173   : > { %v1181_v5 = vmul.f32 %v2901_v25, %v3677_v51 }
 0x175   : > { %v3703_v17 = vsel %vm1148_vm4, %v1181_v5, 0.0  ;;  %v3707_v27 = vsel %vm1149_vm5, %v1181_v5, 0.0 }
 0x176   : > { %5042 = vst [vmem:[#allocation6_spill] sm:$0xff] %v3703_v17  ;;  %5043 = vst [vmem:[#allocation7_spill] sm:$0xff] %v3707_v27 }
 0x17e   : > { %v1095_v8 = vpop.xlane.xlu0 %1094 }
 0x17f   : > { %v3709_v28 = vmax.f32 %v1095_v8, 1e-16  ;;  %vm1152_vm6 = vcmp.eq.f32.partialorder %v3443_v23, %v1095_v8  ;;  %vm1153_vm7 = vcmp.eq.f32.partialorder %v3445_v39, %v1095_v8 }
 0x180   : > { %v3775_v59 = vsel %vm1152_vm6, 1e+30, %v3443_v23  ;;  %v3780_v25 = vsel %vm1153_vm7, 1e+30, %v3445_v39 }
 0x181   : > { %5044 = vst [vmem:[#allocation8_spill] sm:$0xff] %v3709_v28  ;;  %2902 = vrcp.f32 %v3709_v28  ;;  %5048 = vst [vmem:[#allocation12_spill] sm:$0xff] %v3780_v25  ;;  %v1285_v8 = vmin.f32 %v3775_v59, %v3780_v25 }
 0x18b   : > { %v2903_v30 = vpop.eup %2902 }
 0x18c   : > { %v1185_v9 = vmul.f32 %v2903_v30, %v3709_v28 }
 0x18e   : > { %v3717_v19 = vsel %vm1152_vm6, %v1185_v9, 0.0  ;;  %v3721_v21 = vsel %vm1153_vm7, %v1185_v9, 0.0 }
 0x18f   : > { %5045 = vst [vmem:[#allocation9_spill] sm:$0xff] %v3717_v19  ;;  %5046 = vst [vmem:[#allocation10_spill] sm:$0xff] %v3721_v21 }
 0x191   : > { %v1083_v22 = vpop.xlane.xlu1 %1082 }
 0x192   : > { %v3723_v37 = vmax.f32 %v1083_v22, 1e-16  ;;  %vm1144_vm8 = vcmp.eq.f32.partialorder %v3479_v20, %v1083_v22  ;;  %vm1145_vm9 = vcmp.eq.f32.partialorder %v3481_v57, %v1083_v22 }
 0x193   : > { %v3730_v63 = vsel %vm1144_vm8, 1e+30, %v3479_v20  ;;  %v3735_v49 = vsel %vm1145_vm9, 1e+30, %v3481_v57 }
 0x194   : > { %5047 = vst [vmem:[#allocation11_spill] sm:$0xff] %v3723_v37  ;;  %2904 = vrcp.f32 %v3723_v37  ;;  %v1273_v1 = vmin.f32 %v3730_v63, %v3735_v49 }
 0x195   : > { %v1092_v11 = vpop.xlane.xlu1 %1091 }
 0x196   : > { %v3750_v29 = vmax.f32 %v1092_v11, 1e-16  ;;  %vm1150_vm10 = vcmp.eq.f32.partialorder %v3503_v47, %v1092_v11  ;;  %vm1151_vm11 = vcmp.eq.f32.partialorder %v3511_v61, %v1092_v11  ;;  %1274 = vmin.xlane.f32.xlu0 %v1273_v1 }
 0x197   : > { %v3757_v24 = vsel %vm1150_vm10, 1e+30, %v3503_v47  ;;  %v3762_v42 = vsel %vm1151_vm11, 1e+30, %v3511_v61  ;;  %v1101_v44 = vpop.xlane.xlu0 %1100 }
 0x198   : > { %2906 = vrcp.f32 %v3750_v29  ;;  %v1282_v46 = vmin.f32 %v3757_v24, %v3762_v42  ;;  %v3769_v45 = vmax.f32 %v1101_v44, 1e-16  ;;  %vm1156_vm12 = vcmp.eq.f32.partialorder %v3523_v48, %v1101_v44 }
 0x199   : > { %v1098_v56 = vpop.xlane.xlu1 %1097  ;;  %vm1157_vm13 = vcmp.eq.f32.partialorder %v3527_v14, %v1101_v44  ;;  %v3806_v1 = vsel %vm1156_vm12, 1e+30, %v3523_v48 }
 0x19a   : > { %v3783_v5 = vmax.f32 %v1098_v56, 1e-16  ;;  %vm1154_vm14 = vcmp.eq.f32.partialorder %v3517_v31, %v1098_v56  ;;  %vm1155_vm15 = vcmp.eq.f32.partialorder %v3521_v36, %v1098_v56  ;;  %1280 = vmin.xlane.f32.xlu0 %v1279_v50  ;;  %1283 = vmin.xlane.f32.xlu1 %v1282_v46  ;;  %2908 = vrcp.f32 %v3769_v45  ;;  %5049 = vst [vmem:[#allocation13_spill] sm:$0xff] %v3806_v1 }
 0x19b   : > { %v3791_v23 = vsel %vm1154_vm14, 1e+30, %v3517_v31  ;;  %v3796_v39 = vsel %vm1155_vm15, 1e+30, %v3521_v36  ;;  %v3811_v50 = vsel %vm1157_vm13, 1e+30, %v3527_v14 }
 0x19c   : > { %2910 = vrcp.f32 %v3783_v5  ;;  %v1288_v30 = vmin.f32 %v3791_v23, %v3796_v39  ;;  %5050 = vst [vmem:[#allocation14_spill] sm:$0xff] %v3811_v50  ;;  %v1291_v27 = vmin.f32 %v3806_v1, %v3811_v50 }
 0x19d   : > { %v1104_v9 = vpop.xlane.xlu1 %1103 }
 0x19e   : > { %v2905_v46 = vpop.eup %2904  ;;  %v3813_v19 = vmax.f32 %v1104_v9, 1e-16  ;;  %vm1158_vm0 = vcmp.eq.f32.partialorder %v3533_v3, %v1104_v9  ;;  %vm1159_vm1 = vcmp.eq.f32.partialorder %v3535_v60, %v1104_v9  ;;  %1286 = vmin.xlane.f32.xlu0 %v1285_v8  ;;  %1289 = vmin.xlane.f32.xlu1 %v1288_v30 }
 0x19f   : > { %v1177_v21 = vmul.f32 %v2905_v46, %v3723_v37  ;;  %v3821_v28 = vsel %vm1158_vm0, 1e+30, %v3533_v3  ;;  %v3826_v17 = vsel %vm1159_vm1, 1e+30, %v3535_v60 }
 0x1a0   : > { %2912 = vrcp.f32 %v3813_v19  ;;  %v1294_v8 = vmin.f32 %v3821_v28, %v3826_v17 }
 0x1a1   : > { %v3835_v30 = vsel %vm1144_vm8, %v1177_v21, 0.0  ;;  %v3839_v46 = vsel %vm1145_vm9, %v1177_v21, 0.0 }
 0x1a2   : > { %5051 = vst [vmem:[#allocation15_spill] sm:$0xff] %v3835_v30  ;;  %v2907_v51 = vpop.eup %2906  ;;  %1292 = vmin.xlane.f32.xlu0 %v1291_v27  ;;  %1295 = vmin.xlane.f32.xlu1 %v1294_v8 }
 0x1a3   : > { %v1183_v37 = vmul.f32 %v2907_v51, %v3750_v29 }
 0x1a4   : > { %v2909_v25 = vpop.eup %2908 }
 0x1a5   : > { %v3844_v50 = vsel %vm1150_vm10, %v1183_v37, 0.0  ;;  %v3848_v1 = vsel %vm1151_vm11, %v1183_v37, 0.0  ;;  %v1189_v30 = vmul.f32 %v2909_v25, %v3769_v45 }
 0x1a6   : > { %v2911_v20 = vpop.eup %2910 }
 0x1a7   : > { %v1187_v57 = vmul.f32 %v2911_v20, %v3783_v5  ;;  %v3854_v27 = vsel %vm1156_vm12, %v1189_v30, 0.0  ;;  %v3858_v51 = vsel %vm1157_vm13, %v1189_v30, 0.0 }
 0x1a9   : > { %v3862_v47 = vsel %vm1154_vm14, %v1187_v57, 0.0  ;;  %v3866_v61 = vsel %vm1155_vm15, %v1187_v57, 0.0 }
 0x1aa   : > { %v2913_v21 = vpop.eup %2912 }
 0x1ab   : > { %v1191_v22 = vmul.f32 %v2913_v21, %v3813_v19 }
 0x1ad   : > { %v3871_v48 = vsel %vm1158_vm0, %v1191_v22, 0.0  ;;  %v3875_v14 = vsel %vm1159_vm1, %v1191_v22, 0.0 }
 0x1b0   : > { %v1107_v37 = vpop.xlane.xlu0 %1106 }
 0x1b1   : > { %v3877_v11 = vmax.f32 %v1107_v37, 1e-16  ;;  %vm1160_vm2 = vcmp.eq.f32.partialorder %v3557_v38, %v1107_v37  ;;  %vm1161_vm3 = vcmp.eq.f32.partialorder %v3559_v54, %v1107_v37  ;;  %v1110_v31 = vpop.xlane.xlu1 %1109 }
 0x1b2   : > { %v3881_v36 = vmax.f32 %v1110_v31, 1e-16  ;;  %vm1162_vm4 = vcmp.eq.f32.partialorder %v3561_v0, %v1110_v31  ;;  %vm1163_vm5 = vcmp.eq.f32.partialorder %v3563_v55, %v1110_v31  ;;  %v3888_v3 = vsel %vm1160_vm2, 1e+30, %v3557_v38 }
 0x1b3   : > { %2914 = vrcp.f32 %v3877_v11  ;;  %v3894_v60 = vsel %vm1162_vm4, 1e+30, %v3561_v0  ;;  %v3899_v44 = vsel %vm1163_vm5, 1e+30, %v3563_v55  ;;  %v3904_v56 = vsel %vm1161_vm3, 1e+30, %v3559_v54 }
 0x1b4   : > { %5052 = vst [vmem:[#allocation16_spill] sm:$0xff] %v3881_v36  ;;  %5053 = vst [vmem:[#allocation17_spill] sm:$0xff] %v3904_v56  ;;  %2916 = vrcp.f32 %v3881_v36  ;;  %v1297_v25 = vmin.f32 %v3888_v3, %v3904_v56  ;;  %v1300_v9 = vmin.f32 %v3894_v60, %v3899_v44 }
 0x1b6   : > { %1298 = vmin.xlane.f32.xlu0 %v1297_v25  ;;  %1301 = vmin.xlane.f32.xlu1 %v1300_v9 }
 0x1bd   : > { %v2915_v8 = vpop.eup %2914 }
 0x1be   : > { %v2917_v30 = vpop.eup %2916  ;;  %v1193_v20 = vmul.f32 %v2915_v8, %v3877_v11 }
 0x1bf   : > { %v1195_v57 = vmul.f32 %v2917_v30, %v3881_v36 }
 0x1c0   : > { %v3915_v21 = vsel %vm1160_vm2, %v1193_v20, 0.0  ;;  %v3919_v22 = vsel %vm1161_vm3, %v1193_v20, 0.0 }
 0x1c1   : > { %5054 = vst [vmem:[#allocation18_spill] sm:$0xff] %v3915_v21  ;;  %5055 = vst [vmem:[#allocation19_spill] sm:$0xff] %v3919_v22  ;;  %v3923_v56 = vsel %vm1162_vm4, %v1195_v57, 0.0  ;;  %v3927_v25 = vsel %vm1163_vm5, %v1195_v57, 0.0 }
 0x1c2   : > { %5056 = vst [vmem:[#allocation20_spill] sm:$0xff] %v3923_v56  ;;  %5057 = vst [vmem:[#allocation21_spill] sm:$0xff] %v3927_v25 }
 0x1c9   : > { %v1113_v9 = vpop.xlane.xlu0 %1112 }
 0x1ca   : > { %v3929_v8 = vmax.f32 %v1113_v9, 1e-16  ;;  %vm1164_vm6 = vcmp.eq.f32.partialorder %v3587_v15, %v1113_v9  ;;  %vm1165_vm7 = vcmp.eq.f32.partialorder %v3589_v43, %v1113_v9  ;;  %v1116_v38 = vpop.xlane.xlu1 %1115 }
 0x1cb   : > { %v3933_v30 = vmax.f32 %v1116_v38, 1e-16  ;;  %vm1166_vm8 = vcmp.eq.f32.partialorder %v3591_v62, %v1116_v38  ;;  %vm1167_vm9 = vcmp.eq.f32.partialorder %v3593_v7, %v1116_v38  ;;  %v3940_v54 = vsel %vm1164_vm6, 1e+30, %v3587_v15  ;;  %v1639_v15 = vld [vmem:[%s4970_s0 + $0x88] sm:$0xff] }
 0x1cc   : > { %5058 = vst [vmem:[#allocation22_spill] sm:$0xff] %v3929_v8  ;;  %5060 = vst [vmem:[#allocation24_spill] sm:$0xff] %v3940_v54  ;;  %2918 = vrcp.f32 %v3929_v8  ;;  %v3946_v0 = vsel %vm1166_vm8, 1e+30, %v3591_v62  ;;  %v3951_v55 = vsel %vm1167_vm9, 1e+30, %v3593_v7 }
 0x1cd   : > { %5059 = vst [vmem:[#allocation23_spill] sm:$0xff] %v3933_v30  ;;  %5061 = vst [vmem:[#allocation25_spill] sm:$0xff] %v3946_v0  ;;  %v3956_v37 = vsel %vm1165_vm7, 1e+30, %v3589_v43  ;;  %2920 = vrcp.f32 %v3933_v30  ;;  %v1306_v20 = vmin.f32 %v3946_v0, %v3951_v55  ;;  %v1622_v7 = vld [vmem:[%s4970_s0] sm:$0xff] }
 0x1ce   : > { %5062 = vst [vmem:[#allocation26_spill] sm:$0xff] %v3951_v55  ;;  %5063 = vst [vmem:[#allocation27_spill] sm:$0xff] %v3956_v37  ;;  %v1303_v31 = vmin.f32 %v3940_v54, %v3956_v37 }
 0x1cf   : > { %1307 = vmin.xlane.f32.xlu1 %v1306_v20 }
 0x1d0   : > { %1304 = vmin.xlane.f32.xlu0 %v1303_v31 }
 0x1d6   : > { %v2919_v57 = vpop.eup %2918 }
 0x1d7   : > { %v2921_v56 = vpop.eup %2920  ;;  %v1197_v25 = vmul.f32 %v2919_v57, %v3929_v8 }
 0x1d8   : > { %v1199_v21 = vmul.f32 %v2921_v56, %v3933_v30  ;;  %v1638_v56 = vld [vmem:[%s4970_s0 + $0x80] sm:$0xff] }
 0x1d9   : > { %v3967_v22 = vsel %vm1164_vm6, %v1197_v25, 0.0  ;;  %v3971_v36 = vsel %vm1165_vm7, %v1197_v25, 0.0  ;;  %v2735_v25 = vpack.c.bf16 %v1639_v15, %v1638_v56 }
 0x1da   : > { %5064 = vst [vmem:[#allocation28_spill] sm:$0xff] %v3967_v22  ;;  %5065 = vst [vmem:[#allocation29_spill] sm:$0xff] %v3971_v36  ;;  %v3975_v37 = vsel %vm1166_vm8, %v1199_v21, 0.0  ;;  %v3979_v31 = vsel %vm1167_vm9, %v1199_v21, 0.0  ;;  %v1623_v21 = vld [vmem:[%s4970_s0 + $0x8] sm:$0xff] }
 0x1db   : > { %5066 = vst [vmem:[#allocation30_spill] sm:$0xff] %v3975_v37  ;;  %5067 = vst [vmem:[#allocation31_spill] sm:$0xff] %v3979_v31  ;;  %2736 = vmatprep.subr.bf16.mxu0 %v2735_v25  ;;  %v2737_v22 = vpack.c.bf16 %v1623_v21, %v1622_v7  ;;  %v1640_v21 = vld [vmem:[%s4970_s0 + $0x90] sm:$0xff] }
 0x1dd   : > { %2738 = vmatpush3.bf16.msra.mxu0 %v2737_v22 }
 0x1e2   : > { %v1119_v20 = vpop.xlane.xlu0 %1118 }
 0x1e3   : > { %v3987_v43 = vmax.f32 %v1119_v20, 1e-16  ;;  %vm1168_vm10 = vcmp.eq.f32.partialorder %v3617_v35, %v1119_v20  ;;  %vm1169_vm11 = vcmp.eq.f32.partialorder %v3619_v33, %v1119_v20  ;;  %v1122_v62 = vpop.xlane.xlu1 %1121 }
 0x1e4   : > { %v3997_v9 = vmax.f32 %v1122_v62, 1e-16  ;;  %vm1170_vm12 = vcmp.eq.f32.partialorder %v3621_v18, %v1122_v62  ;;  %vm1171_vm13 = vcmp.eq.f32.partialorder %v3623_v32, %v1122_v62  ;;  %v4004_v38 = vsel %vm1168_vm10, 1e+30, %v3617_v35 }
 0x1e5   : > { %2922 = vrcp.f32 %v3987_v43  ;;  %v4010_v57 = vsel %vm1170_vm12, 1e+30, %v3621_v18  ;;  %v4015_v56 = vsel %vm1171_vm13, 1e+30, %v3623_v32  ;;  %v4020_v15 = vsel %vm1169_vm11, 1e+30, %v3619_v33 }
 0x1e6   : > { %5068 = vst [vmem:[#allocation32_spill] sm:$0xff] %v4020_v15  ;;  %2924 = vrcp.f32 %v3997_v9  ;;  %v1309_v37 = vmin.f32 %v4004_v38, %v4020_v15  ;;  %v1312_v31 = vmin.f32 %v4010_v57, %v4015_v56 }
 0x1e8   : > { %1310 = vmin.xlane.f32.xlu0 %v1309_v37  ;;  %1313 = vmin.xlane.f32.xlu1 %v1312_v31 }
 0x1ef   : > { %v2923_v36 = vpop.eup %2922  ;;  %v1272_v55 = vpop.xlane.xlu1 %1271 }
 0x1f0   : > { %v2925_v30 = vpop.eup %2924  ;;  %v1201_v8 = vmul.f32 %v2923_v36, %v3987_v43  ;;  %vm1318_vm14 = vcmp.eq.f32.partialorder %v3644_v6, %v1272_v55  ;;  %vm1319_vm15 = vcmp.eq.f32.partialorder %v3654_v13, %v1272_v55 }
 0x1f1   : > { %v1203_v54 = vmul.f32 %v2925_v30, %v3997_v9  ;;  %v1125_v25 = vpop.xlane.xlu0 %1124  ;;  %v1350_v30 = vmax.f32 %v1272_v55, 1e-16  ;;  %v4050_v35 = vsel %vm1318_vm14, 1e+30, %v3644_v6  ;;  %v4055_v33 = vsel %vm1319_vm15, 1e+30, %v3654_v13 }
 0x1f2   : > { %v4031_v0 = vsel %vm1168_vm10, %v1201_v8, 0.0  ;;  %v4035_v15 = vsel %vm1169_vm11, %v1201_v8, 0.0  ;;  %5072 = vst [vmem:[#allocation36_spill] sm:$0xff] %v4050_v35  ;;  %5073 = vst [vmem:[#allocation37_spill] sm:$0xff] %v4055_v33  ;;  %v4057_v8 = vmax.f32 %v1125_v25, 1e-16  ;;  %vm1172_vm0 = vcmp.eq.f32.partialorder %v3647_v10, %v1125_v25 }
 0x1f3   : > { %5069 = vst [vmem:[#allocation33_spill] sm:$0xff] %v4031_v0  ;;  %v4041_v22 = vsel %vm1170_vm12, %v1203_v54, 0.0  ;;  %v4045_v36 = vsel %vm1171_vm13, %v1203_v54, 0.0  ;;  %vm1173_vm1 = vcmp.eq.f32.partialorder %v3649_v12, %v1125_v25  ;;  %2926 = vrcp.f32 %v1350_v30  ;;  %v1278_v18 = vpop.xlane.xlu1 %1277  ;;  %v1641_v30 = vld [vmem:[%s4970_s0 + $0x98] sm:$0xff]  ;;  %v1646_v13 = vld [vmem:[%s4970_s0 + $0xc0] sm:$0xff] }
 0x1f4   : > { %5070 = vst [vmem:[#allocation34_spill] sm:$0xff] %v4041_v22  ;;  %5071 = vst [vmem:[#allocation35_spill] sm:$0xff] %v4045_v36  ;;  %v1462_v32 = vmin.f32 %v4050_v35, %v4055_v33  ;;  %v4066_v54 = vsel %vm1172_vm0, 1e+30, %v3647_v10  ;;  %v4071_v37 = vsel %vm1173_vm1, 1e+30, %v3649_v12  ;;  %2928 = vrcp.f32 %v4057_v8 }
 0x1f5   : > { %5074 = vst [vmem:[#allocation38_spill] sm:$0xff] %v4066_v54  ;;  %5075 = vst [vmem:[#allocation39_spill] sm:$0xff] %v4071_v37  ;;  %vm1322_vm2 = vcmp.eq.f32.partialorder %v3667_v52, %v1278_v18  ;;  %vm1323_vm3 = vcmp.eq.f32.partialorder %v3672_v41, %v1278_v18  ;;  %v1352_v31 = vmax.f32 %v1278_v18, 1e-16  ;;  %v1315_v7 = vmin.f32 %v4066_v54, %v4071_v37  ;;  %v1625_v37 = vld [vmem:[%s4970_s0 + $0x18] sm:$0xff]  ;;  %v1630_v10 = vld [vmem:[%s4970_s0 + $0x40] sm:$0xff] }
 0x1f6   : > { %v4079_v20 = vsel %vm1322_vm2, 1e+30, %v3667_v52  ;;  %v4084_v62 = vsel %vm1323_vm3, 1e+30, %v3672_v41  ;;  %1463 = vmin.xlane.f32.xlu1 %v1462_v32  ;;  %v2739_v35 = vpack.c.bf16 %v1641_v30, %v1640_v21  ;;  %v1624_v32 = vld [vmem:[%s4970_s0 + $0x10] sm:$0xff]  ;;  %v1643_v21 = vld [vmem:[%s4970_s0 + $0xa8] sm:$0xff] }
 0x1f7   : > { %5076 = vst [vmem:[#allocation40_spill] sm:$0xff] %v4079_v20  ;;  %5077 = vst [vmem:[#allocation41_spill] sm:$0xff] %v4084_v62  ;;  %2930 = vrcp.f32 %v1352_v31  ;;  %v1468_v33 = vmin.f32 %v4079_v20, %v4084_v62  ;;  %1316 = vmin.xlane.f32.xlu0 %v1315_v7  ;;  %v2741_v54 = vpack.c.bf16 %v1625_v37, %v1624_v32  ;;  %v1642_v31 = vld [vmem:[%s4970_s0 + $0xa0] sm:$0xff]  ;;  %v1627_v37 = vld [vmem:[%s4970_s0 + $0x28] sm:$0xff] }
 0x1f8   : > { %2740 = vmatprep.subr.bf16.mxu0 %v2739_v35  ;;  %v1626_v30 = vld [vmem:[%s4970_s0 + $0x20] sm:$0xff]  ;;  %v2743_v62 = vpack.c.bf16 %v1643_v21, %v1642_v31  ;;  %v1644_v35 = vld [vmem:[%s4970_s0 + $0xb0] sm:$0xff]  ;;  %v1629_v31 = vld [vmem:[%s4970_s0 + $0x38] sm:$0xff] }
 0x1f9   : > { %2742 = vmatpush3.bf16.msra.mxu0 %v2741_v54  ;;  %v2745_v54 = vpack.c.bf16 %v1627_v37, %v1626_v30  ;;  %v1628_v32 = vld [vmem:[%s4970_s0 + $0x30] sm:$0xff]  ;;  %v1631_v12 = vld [vmem:[%s4970_s0 + $0x48] sm:$0xff]  ;;  %v1633_v52 = vld [vmem:[%s4970_s0 + $0x58] sm:$0xff] }
 0x1fa   : > { %1469 = vmin.xlane.f32.xlu1 %v1468_v33  ;;  %v1645_v33 = vld [vmem:[%s4970_s0 + $0xb8] sm:$0xff]  ;;  %2744 = vmatprep.subr.bf16.mxu0 %v2743_v62  ;;  %v2749_v20 = vpack.c.bf16 %v1629_v31, %v1628_v32  ;;  %v1632_v41 = vld [vmem:[%s4970_s0 + $0x50] sm:$0xff]  ;;  %v1651_v18 = vld [vmem:[%s4970_s0 + $0xe8] sm:$0xff] }
 0x1fb   : > { %v2747_v7 = vpack.c.bf16 %v1645_v33, %v1644_v35  ;;  %v1635_v32 = vld [vmem:[%s4970_s0 + $0x68] sm:$0xff]  ;;  %v1652_v31 = vld [vmem:[%s4970_s0 + $0xf0] sm:$0xff] }
 0x1fd   : > { %v2927_v21 = vpop.eup %2926  ;;  %2746 = vmatpush3.bf16.msra.mxu0 %v2745_v54 }
 0x1fe   : > { %v2929_v22 = vpop.eup %2928  ;;  %2748 = vmatprep.subr.bf16.mxu0 %v2747_v7  ;;  %v1367_v36 = vmul.f32 %v2927_v21, %v3635_v26  ;;  %v1634_v7 = vld [vmem:[%s4970_s0 + $0x60] sm:$0xff] }
 0x1ff   : > { %v1205_v0 = vmul.f32 %v2929_v22, %v4057_v8  ;;  %v1648_v22 = vld [vmem:[%s4970_s0 + $0xd0] sm:$0xff]  ;;  %v2761_v21 = vpack.c.bf16 %v1635_v32, %v1634_v7 }
 0x200   : > { %v4131_v37 = vsel %vm1319_vm15, %v1367_v36, %v3687_v2  ;;  %v4136_v35 = vsel %vm1318_vm14, %v1367_v36, %v3683_v53  ;;  %v1647_v2 = vld [vmem:[%s4970_s0 + $0xc8] sm:$0xff]  ;;  %v1649_v36 = vld [vmem:[%s4970_s0 + $0xd8] sm:$0xff] }
 0x201   : > { %v2931_v30 = vpop.eup %2930  ;;  %v4140_v62 = vsel %vm1172_vm0, %v1205_v0, 0.0  ;;  %v4144_v33 = vsel %vm1173_vm1, %v1205_v0, 0.0  ;;  %2750 = vmatpush3.bf16.msra.mxu0 %v2749_v20  ;;  %v2751_v53 = vpack.c.bf16 %v1647_v2, %v1646_v13  ;;  %v2753_v0 = vpack.c.bf16 %v1631_v12, %v1630_v10  ;;  %v1636_v13 = vld [vmem:[%s4970_s0 + $0x70] sm:$0xff]  ;;  %v1637_v2 = vld [vmem:[%s4970_s0 + $0x78] sm:$0xff] }
 0x202   : > { %5078 = vst [vmem:[#allocation42_spill] sm:$0xff] %v4140_v62  ;;  %v1371_v6 = vmul.f32 %v2931_v30, %v3660_v34  ;;  %v2755_v20 = vpack.c.bf16 %v1649_v36, %v1648_v22  ;;  %v1653_v30 = vld [vmem:[%s4970_s0 + $0xf8] sm:$0xff]  ;;  %v5098_v62 = vld [vmem:[#allocation15_spill] sm:$0xff] }
 0x203   : > { %2752 = vmatprep.subr.bf16.mxu0 %v2751_v53  ;;  %v2765_v53 = vpack.c.bf16 %v1637_v2, %v1636_v13 }
 0x204   : > { %v4162_v55 = vsel %vm1323_vm3, %v1371_v6, %v3696_v4  ;;  %v4167_v25 = vsel %vm1322_vm2, %v1371_v6, %v3692_v40  ;;  %v2757_v40 = vpack.c.bf16 %v1633_v52, %v1632_v41  ;;  %v1650_v4 = vld [vmem:[%s4970_s0 + $0xe0] sm:$0xff]  ;;  %v2763_v6 = vpack.c.bf16 %v1653_v30, %v1652_v31 }
 0x205   : > { %5079 = vst [vmem:[#allocation43_spill] sm:$0xff] %v4162_v55  ;;  %5080 = vst [vmem:[#allocation44_spill] sm:$0xff] %v4167_v25  ;;  %2754 = vmatpush3.bf16.msra.mxu0 %v2753_v0  ;;  %v2759_v54 = vpack.c.bf16 %v1651_v18, %v1650_v4 }
 0x206   : > { %2756 = vmatprep.subr.bf16.mxu0 %v2755_v20 }
 0x209   : > { %2758 = vmatpush3.bf16.msra.mxu0 %v2757_v40 }
 0x20a   : > { %2760 = vmatprep.subr.bf16.mxu0 %v2759_v54 }
 0x20d   : > { %2762 = vmatpush3.bf16.msra.mxu0 %v2761_v21 }
 0x20e   : > { %2764 = vmatprep.subr.bf16.mxu0 %v2763_v6 }
 0x211   : > { %2766 = vmatpush3.bf16.msra.mxu0 %v2765_v53 }
 0x223   : > { %v4205_v10 = vpop.xlane.xlu0 %1274 }
 0x224   : > { %v1351_v12 = vmax.f32 %v4205_v10, 1e-16  ;;  %vm1320_vm4 = vcmp.eq.f32.partialorder %v3730_v63, %v4205_v10  ;;  %vm1321_vm5 = vcmp.eq.f32.partialorder %v3735_v49, %v4205_v10 }
 0x225   : > { %v4216_v0 = vsel %vm1320_vm4, 1e+30, %v3730_v63  ;;  %v4222_v22 = vsel %vm1321_vm5, 1e+30, %v3735_v49 }
 0x226   : > { %5081 = vst [vmem:[#allocation45_spill] sm:$0xff] %v4216_v0  ;;  %5082 = vst [vmem:[#allocation46_spill] sm:$0xff] %v4222_v22  ;;  %2932 = vrcp.f32 %v1351_v12  ;;  %v1465_v36 = vmin.f32 %v4216_v0, %v4222_v22  ;;  %v5089_v12 = vld [vmem:[#allocation12_spill] sm:$0xff]  ;;  %v5097_v22 = vld [vmem:[#allocation11_spill] sm:$0xff] }
 0x227   : > { %v4226_v20 = vpop.xlane.xlu0 %1280  ;;  %v4228_v41 = vpop.xlane.xlu1 %1283 }
 0x228   : > { %v1353_v52 = vmax.f32 %v4226_v20, 1e-16  ;;  %vm1326_vm6 = vcmp.eq.f32.partialorder %v3757_v24, %v4228_v41  ;;  %vm1327_vm7 = vcmp.eq.f32.partialorder %v3762_v42, %v4228_v41  ;;  %v1354_v40 = vmax.f32 %v4228_v41, 1e-16  ;;  %1466 = vmin.xlane.f32.xlu0 %v1465_v36 }
 0x229   : > { %v4240_v4 = vsel %vm1326_vm6, 1e+30, %v3757_v24  ;;  %v4246_v18 = vsel %vm1327_vm7, 1e+30, %v3762_v42  ;;  %vm1324_vm8 = vcmp.eq.f32.partialorder %v3743_v58, %v4226_v20  ;;  %vm1325_vm9 = vcmp.eq.f32.partialorder %v3748_v16, %v4226_v20 }
 0x22a   : > { %5083 = vst [vmem:[#allocation47_spill] sm:$0xff] %v4240_v4  ;;  %5084 = vst [vmem:[#allocation48_spill] sm:$0xff] %v4246_v18  ;;  %2934 = vrcp.f32 %v1353_v52  ;;  %v4256_v54 = vsel %vm1324_vm8, 1e+30, %v3743_v58  ;;  %v4262_v7 = vsel %vm1325_vm9, 1e+30, %v3748_v16  ;;  %v1474_v32 = vmin.f32 %v4240_v4, %v4246_v18 }
 0x22b   : > { %5085 = vst [vmem:[#allocation49_spill] sm:$0xff] %v4256_v54  ;;  %5086 = vst [vmem:[#allocation50_spill] sm:$0xff] %v4262_v7  ;;  %2936 = vrcp.f32 %v1354_v40  ;;  %v1287_v31 = vpop.xlane.xlu0 %1286  ;;  %v1290_v21 = vpop.xlane.xlu1 %1289  ;;  %v1471_v30 = vmin.f32 %v4256_v54, %v4262_v7 }
 0x22c   : > { %v1355_v13 = vmax.f32 %v1287_v31, 1e-16  ;;  %vm1330_vm10 = vcmp.eq.f32.partialorder %v3791_v23, %v1290_v21  ;;  %vm1331_vm11 = vcmp.eq.f32.partialorder %v3796_v39, %v1290_v21  ;;  %v1356_v2 = vmax.f32 %v1290_v21, 1e-16  ;;  %1475 = vmin.xlane.f32.xlu1 %v1474_v32 }
 0x22d   : > { %v4273_v6 = vsel %vm1330_vm10, 1e+30, %v3791_v23  ;;  %v4278_v53 = vsel %vm1331_vm11, 1e+30, %v3796_v39  ;;  %1472 = vmin.xlane.f32.xlu0 %v1471_v30  ;;  %vm1328_vm12 = vcmp.eq.f32.partialorder %v3775_v59, %v1287_v31  ;;  %vm1329_vm13 = vcmp.eq.f32.partialorder %v5089_v12, %v1287_v31 }
 0x22e   : > { %5087 = vst [vmem:[#allocation51_spill] sm:$0xff] %v4273_v6  ;;  %5088 = vst [vmem:[#allocation52_spill] sm:$0xff] %v4278_v53  ;;  %2938 = vrcp.f32 %v1355_v13  ;;  %v4285_v36 = vsel %vm1328_vm12, 1e+30, %v3775_v59  ;;  %v4290_v52 = vsel %vm1329_vm13, 1e+30, %v5089_v12  ;;  %v1480_v40 = vmin.f32 %v4273_v6, %v4278_v53 }
 0x22f   : > { %5090 = vst [vmem:[#allocation12_spill] sm:$0xff] %v4285_v36  ;;  %5091 = vst [vmem:[#allocation53_spill] sm:$0xff] %v4290_v52  ;;  %2940 = vrcp.f32 %v1356_v2  ;;  %v1293_v32 = vpop.xlane.xlu0 %1292  ;;  %v1296_v30 = vpop.xlane.xlu1 %1295  ;;  %v1477_v7 = vmin.f32 %v4285_v36, %v4290_v52  ;;  %v5093_v52 = vld [vmem:[#allocation13_spill] sm:$0xff]  ;;  %v5094_v36 = vld [vmem:[#allocation14_spill] sm:$0xff] }
 0x230   : > { %v2933_v13 = vpop.eup %2932  ;;  %v1357_v54 = vmax.f32 %v1293_v32, 1e-16  ;;  %vm1334_vm14 = vcmp.eq.f32.partialorder %v3821_v28, %v1296_v30  ;;  %vm1335_vm15 = vcmp.eq.f32.partialorder %v3826_v17, %v1296_v30  ;;  %v1358_v18 = vmax.f32 %v1296_v30, 1e-16  ;;  %1481 = vmin.xlane.f32.xlu1 %v1480_v40 }
 0x231   : > { %v4301_v4 = vsel %vm1334_vm14, 1e+30, %v3821_v28  ;;  %v4306_v2 = vsel %vm1335_vm15, 1e+30, %v3826_v17  ;;  %1478 = vmin.xlane.f32.xlu0 %v1477_v7  ;;  %vm1332_vm0 = vcmp.eq.f32.partialorder %v5093_v52, %v1293_v32  ;;  %vm1333_vm1 = vcmp.eq.f32.partialorder %v5094_v36, %v1293_v32  ;;  %v5105_v28 = vld [vmem:[#allocation17_spill] sm:$0xff] }
 0x232   : > { %5092 = vst [vmem:[#allocation54_spill] sm:$0xff] %v4306_v2  ;;  %2942 = vrcp.f32 %v1357_v54  ;;  %v4313_v40 = vsel %vm1332_vm0, 1e+30, %v5093_v52  ;;  %v4318_v53 = vsel %vm1333_vm1, 1e+30, %v5094_v36  ;;  %v1486_v6 = vmin.f32 %v4301_v4, %v4306_v2  ;;  %v5099_v2 = vld [vmem:[#allocation5_spill] sm:$0xff] }
 0x233   : > { %5095 = vst [vmem:[#allocation13_spill] sm:$0xff] %v4313_v40  ;;  %5096 = vst [vmem:[#allocation14_spill] sm:$0xff] %v4318_v53  ;;  %2944 = vrcp.f32 %v1358_v18  ;;  %v1483_v7 = vmin.f32 %v4313_v40, %v4318_v53  ;;  %v1369_v0 = vmul.f32 %v2933_v13, %v5097_v22  ;;  %v5100_v40 = vld [vmem:[#allocation7_spill] sm:$0xff] }
 0x234   : > { %v2935_v54 = vpop.eup %2934  ;;  %1487 = vmin.xlane.f32.xlu1 %v1486_v6 }
 0x235   : > { %v2937_v25 = vpop.eup %2936  ;;  %1484 = vmin.xlane.f32.xlu0 %v1483_v7  ;;  %v4329_v55 = vsel %vm1321_vm5, %v1369_v0, %v3839_v46  ;;  %v4335_v18 = vsel %vm1320_vm4, %v1369_v0, %v5098_v62  ;;  %v1373_v53 = vmul.f32 %v2935_v54, %v5099_v2  ;;  %v5101_v7 = vld [vmem:[#allocation6_spill] sm:$0xff] }
 0x236   : > { %v1375_v13 = vmul.f32 %v2937_v25, %v3750_v29  ;;  %v5102_v25 = vld [vmem:[#allocation8_spill] sm:$0xff]  ;;  %v5103_v0 = vld [vmem:[#allocation10_spill] sm:$0xff] }
 0x237   : > { %v4343_v6 = vsel %vm1325_vm9, %v1373_v53, %v5100_v40  ;;  %v4349_v49 = vsel %vm1324_vm8, %v1373_v53, %v5101_v7  ;;  %v5104_v53 = vld [vmem:[#allocation9_spill] sm:$0xff] }
 0x238   : > { %v2939_v46 = vpop.eup %2938  ;;  %v4355_v63 = vsel %vm1327_vm7, %v1375_v13, %v3848_v1  ;;  %v4361_v16 = vsel %vm1326_vm6, %v1375_v13, %v3844_v50  ;;  %v5106_v13 = vld [vmem:[#allocation16_spill] sm:$0xff] }
 0x239   : > { %v2941_v62 = vpop.eup %2940  ;;  %v1377_v10 = vmul.f32 %v2939_v46, %v5102_v25 }
 0x23a   : > { %v1379_v58 = vmul.f32 %v2941_v62, %v3783_v5  ;;  %v5108_v62 = vld [vmem:[#allocation18_spill] sm:$0xff] }
 0x23b   : > { %v4368_v20 = vsel %vm1329_vm13, %v1377_v10, %v5103_v0  ;;  %v4373_v42 = vsel %vm1328_vm12, %v1377_v10, %v5104_v53  ;;  %v5111_v53 = vld [vmem:[#allocation20_spill] sm:$0xff] }
 0x23c   : > { %v2943_v1 = vpop.eup %2942  ;;  %v4378_v24 = vsel %vm1331_vm11, %v1379_v58, %v3866_v61  ;;  %v4383_v50 = vsel %vm1330_vm10, %v1379_v58, %v3862_v47  ;;  %v5110_v58 = vld [vmem:[#allocation21_spill] sm:$0xff] }
 0x23d   : > { %v2945_v41 = vpop.eup %2944  ;;  %v1381_v12 = vmul.f32 %v2943_v1, %v3769_v45 }
 0x23e   : > { %v1383_v40 = vmul.f32 %v2945_v41, %v3813_v19 }
 0x23f   : > { %v4390_v59 = vsel %vm1333_vm1, %v1381_v12, %v3858_v51  ;;  %v4395_v39 = vsel %vm1332_vm0, %v1381_v12, %v3854_v27 }
 0x240   : > { %v4400_v23 = vsel %vm1335_vm15, %v1383_v40, %v3875_v14  ;;  %v4405_v47 = vsel %vm1334_vm14, %v1383_v40, %v3871_v48 }
 0x243   : > { %v1299_v61 = vpop.xlane.xlu0 %1298  ;;  %v1302_v31 = vpop.xlane.xlu1 %1301 }
 0x244   : > { %v1359_v21 = vmax.f32 %v1299_v61, 1e-16  ;;  %vm1338_vm2 = vcmp.eq.f32.partialorder %v3894_v60, %v1302_v31  ;;  %vm1339_vm3 = vcmp.eq.f32.partialorder %v3899_v44, %v1302_v31  ;;  %v1360_v51 = vmax.f32 %v1302_v31, 1e-16  ;;  %v5115_v31 = vld [vmem:[#allocation27_spill] sm:$0xff] }
 0x245   : > { %v4412_v27 = vsel %vm1338_vm2, 1e+30, %v3894_v60  ;;  %v4417_v17 = vsel %vm1339_vm3, 1e+30, %v3899_v44  ;;  %vm1336_vm4 = vcmp.eq.f32.partialorder %v3888_v3, %v1299_v61  ;;  %vm1337_vm5 = vcmp.eq.f32.partialorder %v5105_v28, %v1299_v61  ;;  %v5112_v61 = vld [vmem:[#allocation25_spill] sm:$0xff]  ;;  %v5114_v60 = vld [vmem:[#allocation24_spill] sm:$0xff] }
 0x246   : > { %2946 = vrcp.f32 %v1359_v21  ;;  %v4422_v48 = vsel %vm1336_vm4, 1e+30, %v3888_v3  ;;  %v4425_v14 = vsel %vm1337_vm5, 1e+30, %v5105_v28  ;;  %v1492_v36 = vmin.f32 %v4412_v27, %v4417_v17  ;;  %v5107_v3 = vld [vmem:[#allocation19_spill] sm:$0xff]  ;;  %v5113_v21 = vld [vmem:[#allocation26_spill] sm:$0xff] }
 0x247   : > { %2948 = vrcp.f32 %v1360_v51  ;;  %v1489_v52 = vmin.f32 %v4422_v48, %v4425_v14 }
 0x248   : > { %1493 = vmin.xlane.f32.xlu1 %v1492_v36 }
 0x249   : > { %1490 = vmin.xlane.f32.xlu0 %v1489_v52 }
 0x250   : > { %v2947_v32 = vpop.eup %2946 }
 0x251   : > { %v2949_v30 = vpop.eup %2948  ;;  %v1385_v54 = vmul.f32 %v2947_v32, %v3877_v11 }
 0x252   : > { %v1387_v7 = vmul.f32 %v2949_v30, %v5106_v13 }
 0x253   : > { %v4434_v46 = vsel %vm1337_vm5, %v1385_v54, %v5107_v3  ;;  %v4437_v10 = vsel %vm1336_vm4, %v1385_v54, %v5108_v62  ;;  %v5118_v3 = vld [vmem:[#allocation22_spill] sm:$0xff]  ;;  %vm1931_vm4 = vcmask 261120  }
 0x254   : > { %5109 = vst [vmem:[#allocation11_spill] sm:$0xff] %v4437_v10  ;;  %v4442_v0 = vsel %vm1339_vm3, %v1387_v7, %v5110_v58  ;;  %v4447_v1 = vsel %vm1338_vm2, %v1387_v7, %v5111_v53  ;;  %v5119_v58 = vld [vmem:[#allocation23_spill] sm:$0xff] }
 0x255   : > { %v5124_v10 = vld [vmem:[#allocation31_spill] sm:$0xff] }
 0x25c   : > { %v1308_v12 = vpop.xlane.xlu1 %1307 }
 0x25d   : > { %v1305_v41 = vpop.xlane.xlu0 %1304  ;;  %vm1342_vm6 = vcmp.eq.f32.partialorder %v5112_v61, %v1308_v12  ;;  %vm1343_vm7 = vcmp.eq.f32.partialorder %v5113_v21, %v1308_v12  ;;  %v1362_v51 = vmax.f32 %v1308_v12, 1e-16  ;;  %v5128_v12 = vld [vmem:[#allocation32_spill] sm:$0xff] }
 0x25e   : > { %v1361_v40 = vmax.f32 %v1305_v41, 1e-16  ;;  %v4454_v28 = vsel %vm1342_vm6, 1e+30, %v5112_v61  ;;  %v4459_v44 = vsel %vm1343_vm7, 1e+30, %v5113_v21  ;;  %vm1340_vm8 = vcmp.eq.f32.partialorder %v5114_v60, %v1305_v41 }
 0x25f   : > { %vm1341_vm9 = vcmp.eq.f32.partialorder %v5115_v31, %v1305_v41  ;;  %v4464_v36 = vsel %vm1340_vm8, 1e+30, %v5114_v60  ;;  %v1498_v32 = vmin.f32 %v4454_v28, %v4459_v44  ;;  %v5120_v41 = vld [vmem:[#allocation29_spill] sm:$0xff]  ;;  %v5122_v60 = vld [vmem:[#allocation28_spill] sm:$0xff] }
 0x260   : > { %2950 = vrcp.f32 %v1361_v40  ;;  %5116 = vst [vmem:[#allocation15_spill] sm:$0xff] %v4464_v36  ;;  %v4467_v52 = vsel %vm1341_vm9, 1e+30, %v5115_v31 }
 0x261   : > { %5117 = vst [vmem:[#allocation5_spill] sm:$0xff] %v4467_v52  ;;  %2952 = vrcp.f32 %v1362_v51  ;;  %v1495_v30 = vmin.f32 %v4464_v36, %v4467_v52  ;;  %1499 = vmin.xlane.f32.xlu1 %v1498_v32  ;;  %v5126_v52 = vld [vmem:[#allocation30_spill] sm:$0xff] }
 0x263   : > { %1496 = vmin.xlane.f32.xlu0 %v1495_v30 }
 0x26a   : > { %v2951_v54 = vpop.eup %2950 }
 0x26b   : > { %v2953_v7 = vpop.eup %2952  ;;  %v1389_v62 = vmul.f32 %v2951_v54, %v5118_v3  ;;  %v5132_v3 = vld [vmem:[#allocation33_spill] sm:$0xff] }
 0x26c   : > { %v1391_v53 = vmul.f32 %v2953_v7, %v5119_v58 }
 0x26d   : > { %v4476_v40 = vsel %vm1341_vm9, %v1389_v62, %v5120_v41  ;;  %v4479_v31 = vsel %vm1340_vm8, %v1389_v62, %v5122_v60 }
 0x26e   : > { %5121 = vst [vmem:[#allocation7_spill] sm:$0xff] %v4476_v40  ;;  %5123 = vst [vmem:[#allocation6_spill] sm:$0xff] %v4479_v31  ;;  %v4484_v51 = vsel %vm1343_vm7, %v1391_v53, %v5124_v10  ;;  %v4489_v32 = vsel %vm1342_vm6, %v1391_v53, %v5126_v52 }
 0x26f   : > { %5125 = vst [vmem:[#allocation8_spill] sm:$0xff] %v4484_v51  ;;  %5127 = vst [vmem:[#allocation10_spill] sm:$0xff] %v4489_v32 }
 0x275   : > { %v1311_v30 = vpop.xlane.xlu0 %1310  ;;  %v1314_v54 = vpop.xlane.xlu1 %1313 }
 0x276   : > { %v1363_v36 = vmax.f32 %v1311_v30, 1e-16  ;;  %vm1346_vm10 = vcmp.eq.f32.partialorder %v4010_v57, %v1314_v54  ;;  %vm1347_vm11 = vcmp.eq.f32.partialorder %v4015_v56, %v1314_v54  ;;  %v1364_v7 = vmax.f32 %v1314_v54, 1e-16  ;;  %v5139_v54 = vld [vmem:[#allocation36_spill] sm:$0xff] }
 0x277   : > { %v4496_v62 = vsel %vm1346_vm10, 1e+30, %v4010_v57  ;;  %v4501_v10 = vsel %vm1347_vm11, 1e+30, %v4015_v56  ;;  %vm1344_vm12 = vcmp.eq.f32.partialorder %v4004_v38, %v1311_v30  ;;  %vm1345_vm13 = vcmp.eq.f32.partialorder %v5128_v12, %v1311_v30 }
 0x278   : > { %2954 = vrcp.f32 %v1363_v36  ;;  %v4508_v61 = vsel %vm1344_vm12, 1e+30, %v4004_v38  ;;  %v4511_v21 = vsel %vm1345_vm13, 1e+30, %v5128_v12  ;;  %v1504_v52 = vmin.f32 %v4496_v62, %v4501_v10 }
 0x279   : > { %5129 = vst [vmem:[#allocation9_spill] sm:$0xff] %v4508_v61  ;;  %5130 = vst [vmem:[#allocation17_spill] sm:$0xff] %v4511_v21  ;;  %2956 = vrcp.f32 %v1364_v7  ;;  %v1501_v53 = vmin.f32 %v4508_v61, %v4511_v21  ;;  %v5134_v21 = vld [vmem:[#allocation35_spill] sm:$0xff] }
 0x27a   : > { %1505 = vmin.xlane.f32.xlu1 %v1504_v52 }
 0x27b   : > { %1502 = vmin.xlane.f32.xlu0 %v1501_v53  ;;  %v5135_v53 = vld [vmem:[#allocation34_spill] sm:$0xff] }
 0x282   : > { %v2955_v41 = vpop.eup %2954 }
 0x283   : > { %v2957_v60 = vpop.eup %2956  ;;  %v1393_v36 = vmul.f32 %v2955_v41, %v3987_v43  ;;  %v1464_v31 = vpop.xlane.xlu1 %1463 }
 0x284   : > { %v1395_v40 = vmul.f32 %v2957_v60, %v3997_v9  ;;  %v1542_v32 = vmax.f32 %v1464_v31, 1e-16  ;;  %v1317_v51 = vpop.xlane.xlu0 %1316  ;;  %vm1510_vm0 = vcmp.eq.f32.partialorder %v5139_v54, %v1464_v31 }
 0x285   : > { %v4520_v12 = vsel %vm1345_vm13, %v1393_v36, %v4035_v15  ;;  %v4525_v7 = vsel %vm1344_vm12, %v1393_v36, %v5132_v3  ;;  %v1365_v60 = vmax.f32 %v1317_v51, 1e-16  ;;  %v5136_v15 = vld [vmem:[#allocation38_spill] sm:$0xff] }
 0x286   : > { %5131 = vst [vmem:[#allocation16_spill] sm:$0xff] %v4520_v12  ;;  %5133 = vst [vmem:[#allocation19_spill] sm:$0xff] %v4525_v7  ;;  %v4530_v52 = vsel %vm1347_vm11, %v1395_v40, %v5134_v21  ;;  %v4535_v41 = vsel %vm1346_vm10, %v1395_v40, %v5135_v53  ;;  %2958 = vrcp.f32 %v1542_v32  ;;  %vm1348_vm14 = vcmp.eq.f32.partialorder %v5136_v15, %v1317_v51  ;;  %v5137_v12 = vld [vmem:[#allocation39_spill] sm:$0xff]  ;;  %v5140_v21 = vld [vmem:[#allocation37_spill] sm:$0xff] }
 0x287   : > { %vm1349_vm15 = vcmp.eq.f32.partialorder %v5137_v12, %v1317_v51  ;;  %v1470_v61 = vpop.xlane.xlu1 %1469  ;;  %v4542_v38 = vsel %vm1348_vm14, 1e+30, %v5136_v15  ;;  %2960 = vrcp.f32 %v1365_v60  ;;  %vm1511_vm1 = vcmp.eq.f32.partialorder %v5140_v21, %v1464_v31  ;;  %v1911_v15 = vld [vmem:[%s4590_s25] sm:$0xff]  ;;  %v1912_v21 = vld [vmem:[%s4590_s25 + $0x8] sm:$0xff] }
 0x288   : > { %v4547_v56 = vsel %vm1349_vm15, 1e+30, %v5137_v12  ;;  %v1544_v57 = vmax.f32 %v1470_v61, 1e-16  ;;  %v1930_v12 = vld [vmem:[%s4976_s6 + $0x18] sm:$0xff]  ;;  %2655 = vmatprep.mubr.msk.f32.mxu1 %vm1931_vm4, %v1911_v15 }
 0x289   : > { %5138 = vst [vmem:[#allocation18_spill] sm:$0xff] %v4547_v56  ;;  %v1507_v3 = vmin.f32 %v4542_v38, %v4547_v56  ;;  %v5151_v56 = vld [vmem:[#allocation48_spill] sm:$0xff] }
 0x28a   : > { %2962 = vrcp.f32 %v1544_v57 }
 0x28b   : > { %1508 = vmin.xlane.f32.xlu0 %v1507_v3  ;;  %v5142_v3 = vld [vmem:[#allocation42_spill] sm:$0xff] }
 0x290   : > { %v2959_v40 = vpop.eup %2958 }
 0x291   : > { %v1559_v32 = vmul.f32 %v2959_v40, %v3635_v26  ;;  %v2961_v30 = vpop.eup %2960  ;;  %v5146_v40 = vld [vmem:[#allocation43_spill] sm:$0xff] }
 0x292   : > { %v1397_v60 = vmul.f32 %v2961_v30, %v4057_v8  ;;  %v5147_v30 = vld [vmem:[#allocation44_spill] sm:$0xff] }
 0x293   : > { %v1591_v36 = vsel %vm1511_vm1, %v1559_v32, %v4131_v37  ;;  %v1590_v53 = vsel %vm1510_vm0, %v1559_v32, %v4136_v35  ;;  %v5144_v37 = vld [vmem:[#allocation40_spill] sm:$0xff]  ;;  %v5145_v35 = vld [vmem:[#allocation41_spill] sm:$0xff] }
 0x294   : > { %v2963_v7 = vpop.eup %2962  ;;  %1718 = vmatprep.mubr.f32.mxu0 %v1591_v36  ;;  %v4561_v26 = vsel %vm1349_vm15, %v1397_v60, %v4144_v33  ;;  %v4566_v31 = vsel %vm1348_vm14, %v1397_v60, %v5142_v3  ;;  %vm1514_vm2 = vcmp.eq.f32.partialorder %v5144_v37, %v1470_v61  ;;  %vm1515_vm3 = vcmp.eq.f32.partialorder %v5145_v35, %v1470_v61  ;;  %v1928_v33 = vld [vmem:[%s4976_s6 + $0x8] sm:$0xff]  ;;  %v1929_v61 = vld [vmem:[%s4976_s6 + $0x10] sm:$0xff]  ;;  %v1915_v60 = vld [vmem:[%s4590_s25 + $0x20] sm:$0xff] }
 0x295   : > { %1719 = vmatmul.mubr.f32.vlgmr.msra.gmra.mrb[0].mxu0 %v1590_v53  ;;  %v1563_v57 = vmul.f32 %v2963_v7, %v3660_v34  ;;  %5141 = vst [vmem:[#allocation21_spill] sm:$0xff] %v4561_v26  ;;  %5143 = vst [vmem:[#allocation20_spill] sm:$0xff] %v4566_v31  ;;  %v1927_v34 = vld [vmem:[%s4976_s6] sm:$0xff]  ;;  %v2771_v7 = vpack.c.bf16 %v1930_v12, %v1929_v61  ;;  %v1913_v36 = vld [vmem:[%s4590_s25 + $0x10] sm:$0xff] }
 0x296   : > { %v2767_v51 = vpack.c.bf16 %v1928_v33, %v1927_v34  ;;  %v1914_v53 = vld [vmem:[%s4590_s25 + $0x18] sm:$0xff]  ;;  %v5150_v26 = vld [vmem:[#allocation47_spill] sm:$0xff] }
 0x297   : > { %v1595_v32 = vsel %vm1515_vm3, %v1563_v57, %v5146_v40  ;;  %v4572_v54 = vsel %vm1514_vm2, %v1563_v57, %v5147_v30  ;;  %v1916_v57 = vld [vmem:[%s4590_s25 + $0x28] sm:$0xff] }
 0x298   : > { %2768 = vmatprep.subr.bf16.mxu1 %v2767_v51 }
 0x299   : > { %2770 = vmatpush3.bf16.msra.mxu1 %v2767_v51 }
 0x29a   : > { %2772 = vmatprep.subr.bf16.mxu1 %v2771_v7 }
 0x29d   : > { %2774 = vmatpush3.bf16.msra.mxu1 %v2771_v7 }
 0x2a0   : > { %2656 = vmatmul.mubr.msk.f32.vlgmr.msra.gmra.mrb[0].mxu1 %vm1931_vm4, %v1912_v21 }
 0x2a1   : > { %2658 = vmatprep.mubr.msk.f32.mxu1 %vm1931_vm4, %v1913_v36 }
 0x2a4   : > { %2659 = vmatmul.mubr.msk.f32.gmra.mrb[2].mxu1 %vm1931_vm4, %v1914_v53 }
 0x2a5   : > { %2661 = vmatprep.mubr.msk.f32.mxu1 %vm1931_vm4, %v1915_v60 }
 0x2a8   : > { %2662 = vmatmul.mubr.msk.f32.gmra.mrb[4].mxu1 %vm1931_vm4, %v1916_v57  ;;  %v5148_v57 = vld [vmem:[#allocation45_spill] sm:$0xff] }
 0x2b5   : > { %v1467_v3 = vpop.xlane.xlu0 %1466 }
 0x2b6   : > { %v1543_v37 = vmax.f32 %v1467_v3, 1e-16  ;;  %vm1512_vm5 = vcmp.eq.f32.partialorder %v5148_v57, %v1467_v3 }
 0x2b8   : > { %2964 = vrcp.f32 %v1543_v37  ;;  %v5149_v37 = vld [vmem:[#allocation46_spill] sm:$0xff] }
 0x2b9   : > { %v1476_v35 = vpop.xlane.xlu1 %1475  ;;  %vm1513_vm6 = vcmp.eq.f32.partialorder %v5149_v37, %v1467_v3  ;;  %v5152_v3 = vld [vmem:[#allocation49_spill] sm:$0xff] }
 0x2ba   : > { %v1473_v40 = vpop.xlane.xlu0 %1472  ;;  %v1546_v30 = vmax.f32 %v1476_v35, 1e-16  ;;  %vm1518_vm7 = vcmp.eq.f32.partialorder %v5150_v26, %v1476_v35  ;;  %vm1519_vm8 = vcmp.eq.f32.partialorder %v5151_v56, %v1476_v35  ;;  %v5154_v26 = vld [vmem:[#allocation51_spill] sm:$0xff] }
 0x2bb   : > { %v1545_v34 = vmax.f32 %v1473_v40, 1e-16  ;;  %vm1516_vm9 = vcmp.eq.f32.partialorder %v5152_v3, %v1473_v40  ;;  %v1923_v3 = vld [vmem:[%s4590_s25 + $0x60] sm:$0xff] }
 0x2bc   : > { %2966 = vrcp.f32 %v1546_v30 }
 0x2bd   : > { %2968 = vrcp.f32 %v1545_v34  ;;  %v1482_v33 = vpop.xlane.xlu1 %1481 }
 0x2be   : > { %v1479_v51 = vpop.xlane.xlu0 %1478  ;;  %v1548_v61 = vmax.f32 %v1482_v33, 1e-16  ;;  %vm1522_vm11 = vcmp.eq.f32.partialorder %v5154_v26, %v1482_v33  ;;  %v5165_v26 = vld [vmem:[#allocation8_spill] sm:$0xff] }
 0x2bf   : > { %v1547_v12 = vmax.f32 %v1479_v51, 1e-16 }
 0x2c0   : > { %2970 = vrcp.f32 %v1548_v61 }
 0x2c1   : > { %2972 = vrcp.f32 %v1547_v12  ;;  %v1488_v7 = vpop.xlane.xlu1 %1487 }
 0x2c2   : > { %v2965_v15 = vpop.eup %2964  ;;  %v1485_v21 = vpop.xlane.xlu0 %1484  ;;  %v1550_v36 = vmax.f32 %v1488_v7, 1e-16  ;;  %vm1526_vm15 = vcmp.eq.f32.partialorder %v4301_v4, %v1488_v7 }
 0x2c3   : > { %v1549_v53 = vmax.f32 %v1485_v21, 1e-16  ;;  %v1561_v60 = vmul.f32 %v2965_v15, %v5097_v22  ;;  %v5153_v15 = vld [vmem:[#allocation50_spill] sm:$0xff] }
 0x2c4   : > { %2974 = vrcp.f32 %v1550_v36  ;;  %vm1517_vm10 = vcmp.eq.f32.partialorder %v5153_v15, %v1473_v40 }
 0x2c5   : > { %2976 = vrcp.f32 %v1549_v53  ;;  %v1593_v30 = vsel %vm1513_vm6, %v1561_v60, %v4329_v55  ;;  %v1592_v34 = vsel %vm1512_vm5, %v1561_v60, %v4335_v18  ;;  %v5159_v60 = vld [vmem:[#allocation13_spill] sm:$0xff] }
 0x2c6   : > { %v2967_v31 = vpop.eup %2966  ;;  %1723 = vmatprep.mubr.f32.mxu0 %v1593_v30  ;;  %vm1524_vm1 = vcmp.eq.f32.partialorder %v5159_v60, %v1485_v21  ;;  %v5170_v60 = vld [vmem:[#allocation17_spill] sm:$0xff] }
 0x2c7   : > { %v2969_v61 = vpop.eup %2968  ;;  %1724 = vmatmul.mubr.f32.gmra.mrb[2].mxu0 %v1592_v34  ;;  %v1567_v12 = vmul.f32 %v2967_v31, %v3750_v29  ;;  %v5161_v34 = vld [vmem:[#allocation11_spill] sm:$0xff] }
 0x2c8   : > { %1728 = vmatprep.mubr.f32.mxu0 %v1595_v32  ;;  %v1565_v22 = vmul.f32 %v2969_v61, %v5099_v2  ;;  %v5155_v2 = vld [vmem:[#allocation52_spill] sm:$0xff] }
 0x2c9   : > { %v1599_v55 = vsel %vm1519_vm8, %v1567_v12, %v4355_v63  ;;  %v1598_v18 = vsel %vm1518_vm7, %v1567_v12, %v4361_v16  ;;  %vm1523_vm12 = vcmp.eq.f32.partialorder %v5155_v2, %v1482_v33  ;;  %v5156_v63 = vld [vmem:[#allocation12_spill] sm:$0xff]  ;;  %v5157_v16 = vld [vmem:[#allocation53_spill] sm:$0xff]  ;;  %v1921_v12 = vld [vmem:[%s4590_s25 + $0x50] sm:$0xff] }
 0x2ca   : > { %v2971_v36 = vpop.eup %2970  ;;  %v1597_v53 = vsel %vm1517_vm10, %v1565_v22, %v4343_v6  ;;  %v1596_v29 = vsel %vm1516_vm9, %v1565_v22, %v4349_v49  ;;  %vm1520_vm13 = vcmp.eq.f32.partialorder %v5156_v63, %v1479_v51  ;;  %vm1521_vm14 = vcmp.eq.f32.partialorder %v5157_v16, %v1479_v51  ;;  %v1922_v22 = vld [vmem:[%s4590_s25 + $0x58] sm:$0xff]  ;;  %v5167_v16 = vld [vmem:[#allocation7_spill] sm:$0xff] }
 0x2cb   : > { %v2973_v31 = vpop.eup %2972  ;;  %1729 = vmatmul.mubr.f32.gmra.mrb[4].mxu0 %v4572_v54  ;;  %v1571_v56 = vmul.f32 %v2971_v36, %v3783_v5 }
 0x2cc   : > { %1733 = vmatprep.mubr.f32.mxu0 %v1597_v53  ;;  %v1569_v32 = vmul.f32 %v2973_v31, %v5102_v25  ;;  %v5158_v25 = vld [vmem:[#allocation54_spill] sm:$0xff]  ;;  %v5163_v31 = vld [vmem:[#allocation15_spill] sm:$0xff] }
 0x2cd   : > { %v1603_v6 = vsel %vm1523_vm12, %v1571_v56, %v4378_v24  ;;  %v1602_v49 = vsel %vm1522_vm11, %v1571_v56, %v4383_v50  ;;  %vm1527_vm0 = vcmp.eq.f32.partialorder %v5158_v25, %v1488_v7  ;;  %v5160_v24 = vld [vmem:[#allocation14_spill] sm:$0xff]  ;;  %v5164_v56 = vld [vmem:[#allocation5_spill] sm:$0xff] }
 0x2ce   : > { %v2975_v35 = vpop.eup %2974  ;;  %v1601_v54 = vsel %vm1521_vm14, %v1569_v32, %v4368_v20  ;;  %v1600_v5 = vsel %vm1520_vm13, %v1569_v32, %v4373_v42  ;;  %vm1525_vm2 = vcmp.eq.f32.partialorder %v5160_v24, %v1485_v21  ;;  %v5162_v53 = vld [vmem:[#allocation22_spill] sm:$0xff] }
 0x2cf   : > { %v2977_v40 = vpop.eup %2976  ;;  %1734 = vmatmul.mubr.f32.gmra.mrb[6].mxu0 %v1596_v29  ;;  %v1575_v33 = vmul.f32 %v2975_v35, %v3813_v19  ;;  %v5166_v32 = vld [vmem:[#allocation10_spill] sm:$0xff] }
 0x2d0   : > { %1738 = vmatprep.mubr.f32.mxu0 %v1599_v55  ;;  %v1573_v51 = vmul.f32 %v2977_v40, %v3769_v45  ;;  %v1924_v55 = vld [vmem:[%s4590_s25 + $0x68] sm:$0xff] }
 0x2d1   : > { %v1607_v50 = vsel %vm1527_vm0, %v1575_v33, %v4400_v23  ;;  %v1606_v20 = vsel %vm1526_vm15, %v1575_v33, %v4405_v47 }
 0x2d2   : > { %v1605_v42 = vsel %vm1525_vm2, %v1573_v51, %v4390_v59  ;;  %v1604_v57 = vsel %vm1524_vm1, %v1573_v51, %v4395_v39  ;;  %v5169_v51 = vld [vmem:[#allocation9_spill] sm:$0xff] }
 0x2d3   : > { %1739 = vmatmul.mubr.f32.gmra.mrb[8].mxu0 %v1598_v18 }
 0x2d4   : > { %1743 = vmatprep.mubr.f32.mxu0 %v1601_v54 }
 0x2d5   : > { %v1494_v19 = vpop.xlane.xlu1 %1493 }
 0x2d6   : > { %v1491_v4 = vpop.xlane.xlu0 %1490  ;;  %v1552_v7 = vmax.f32 %v1494_v19, 1e-16  ;;  %vm1530_vm3 = vcmp.eq.f32.partialorder %v4412_v27, %v1494_v19  ;;  %vm1531_vm5 = vcmp.eq.f32.partialorder %v4417_v17, %v1494_v19  ;;  %v1917_v27 = vld [vmem:[%s4590_s25 + $0x30] sm:$0xff]  ;;  %v1919_v17 = vld [vmem:[%s4590_s25 + $0x40] sm:$0xff] }
 0x2d7   : > { %v1551_v37 = vmax.f32 %v1491_v4, 1e-16  ;;  %1744 = vmatmul.mubr.f32.gmra.mrb[10].mxu0 %v1600_v5  ;;  %vm1528_vm6 = vcmp.eq.f32.partialorder %v4422_v48, %v1491_v4  ;;  %vm1529_vm7 = vcmp.eq.f32.partialorder %v4425_v14, %v1491_v4  ;;  %2664 = vmatprep.mubr.msk.f32.mxu1 %vm1931_vm4, %v1917_v27  ;;  %v3091_v14 = vmov 64  }
 0x2d8   : > { %2978 = vrcp.f32 %v1552_v7  ;;  %1748 = vmatprep.mubr.f32.mxu0 %v1603_v6  ;;  %2894 = vset.pattern.permute.xlu1 %v3091_v14  ;;  %v5175_v7 = vld [vmem:[#allocation20_spill] sm:$0xff] }
 0x2d9   : > { %2980 = vrcp.f32 %v1551_v37  ;;  %2895 = vset.pattern.permute.xlu0 %v3091_v14  ;;  %v2185_v14 = vld [vmem:[%s4978_s8 + $0x28] sm:$0xff] }
 0x2db   : > { %1749 = vmatmul.mubr.f32.gmra.mrb[12].mxu0 %v1602_v49  ;;  %v5168_v49 = vld [vmem:[#allocation6_spill] sm:$0xff] }
 0x2dc   : > { %1753 = vmatprep.mubr.f32.mxu0 %v1605_v42 }
 0x2df   : > { %1754 = vmatmul.mubr.f32.gmra.mrb[14].mxu0 %v1604_v57  ;;  %v5172_v57 = vld [vmem:[#allocation19_spill] sm:$0xff] }
 0x2e0   : > { %1758 = vmatprep.mubr.f32.mxu0 %v1607_v50 }
 0x2e2   : > { %v2979_v45 = vpop.eup %2978 }
 0x2e3   : > { %v2981_v23 = vpop.eup %2980  ;;  %1759 = vmatmul.mubr.f32.gmra.mrb[16].mxu0 %v1606_v20  ;;  %v1579_v59 = vmul.f32 %v2979_v45, %v5106_v13  ;;  %v5171_v20 = vld [vmem:[#allocation16_spill] sm:$0xff]  ;;  %v1925_v45 = vld [vmem:[%s4590_s25 + $0x70] sm:$0xff] }
 0x2e4   : > { %v1577_v39 = vmul.f32 %v2981_v23, %v3877_v11  ;;  %v1918_v11 = vld [vmem:[%s4590_s25 + $0x38] sm:$0xff] }
 0x2e5   : > { %v1611_v47 = vsel %vm1531_vm5, %v1579_v59, %v4442_v0  ;;  %v1610_v21 = vsel %vm1530_vm3, %v1579_v59, %v4447_v1  ;;  %2665 = vmatmul.mubr.msk.f32.gmra.mrb[6].mxu1 %vm1931_vm4, %v1918_v11  ;;  %v1920_v1 = vld [vmem:[%s4590_s25 + $0x48] sm:$0xff]  ;;  %v1926_v23 = vld [vmem:[%s4590_s25 + $0x78] sm:$0xff]  ;;  %s3028_s25 = sshll.u32 %s3092_s20, 4  ;;  %s3029_s25 = int_to_ptr.vmem [resolvable:$false] %s3028_s25 }
 0x2e6   : > { %v1609_v30 = vsel %vm1529_vm7, %v1577_v39, %v4434_v46  ;;  %v1608_v13 = vsel %vm1528_vm6, %v1577_v39, %v5161_v34  ;;  %2667 = vmatprep.mubr.msk.f32.mxu1 %vm1931_vm4, %v1919_v17  ;;  %v2181_v34 = vld [vmem:[%s4978_s8 + $0x8] sm:$0xff]  ;;  %v2183_v11 = vld [vmem:[%s4978_s8 + $0x18] sm:$0xff]  ;;  %s3030_s26 = scalar_lea.vmem %s3029_s25, 4096  ;;  %p3031_p0 = scmp.lt.s32.totalorder %s4923_s29, %s3029_s25 }
 0x2e7   : > { %1763 = vmatprep.mubr.f32.mxu0 %v1609_v30  ;;  %v2180_v30 = vld [vmem:[%s4978_s8] sm:$0xff]  ;;  %p3032_p1 = scmp.lt.s32.totalorder %s3030_s26, %s3024_s18 }
 0x2e8   : > { %1764 = vmatmul.mubr.f32.gmra.mrb[18].mxu0 %v1608_v13  ;;  %v2182_v13 = vld [vmem:[%s4978_s8 + $0x10] sm:$0xff]  ;;  %v2775_v27 = vpack.c.bf16 %v2181_v34, %v2180_v30 }
 0x2e9   : > { %1768 = vmatprep.mubr.f32.mxu0 %v1611_v47  ;;  %2668 = vmatmul.mubr.msk.f32.gmra.mrb[8].mxu1 %vm1931_vm4, %v1920_v1  ;;  %v2779_v17 = vpack.c.bf16 %v2183_v11, %v2182_v13  ;;  %v2187_v1 = vld [vmem:[%s4978_s8 + $0x38] sm:$0xff]  ;;  %p3033_p2 = por %p3032_p1, %p3031_p0 }
 0x2ea   : > { %2670 = vmatprep.mubr.msk.f32.mxu1 %vm1931_vm4, %v1921_v12  ;;  %2776 = vmatprep.subr.bf16.mxu1 %v2775_v27  ;;  %v2188_v12 = vld [vmem:[%s4978_s8 + $0x40] sm:$0xff] }
 0x2eb   : > { %2778 = vmatpush3.bf16.msra.mxu1 %v2775_v27  ;;  %p3034_p3 = pnand %p3033_p2, %p3027_p13 }
 0x2ec   : > { %1769 = vmatmul.mubr.f32.gmra.mrb[20].mxu0 %v1610_v21  ;;  %2780 = vmatprep.subr.bf16.mxu1 %v2779_v17 }
 0x2ed   : > { %2671 = vmatmul.mubr.msk.f32.gmra.mrb[10].mxu1 %vm1931_vm4, %v1922_v22  ;;  %v2189_v22 = vld [vmem:[%s4978_s8 + $0x48] sm:$0xff] }
 0x2ee   : > { %v1500_v48 = vpop.xlane.xlu1 %1499  ;;  %2673 = vmatprep.mubr.msk.f32.mxu1 %vm1931_vm4, %v1923_v3 }
 0x2ef   : > { %v1554_v0 = vmax.f32 %v1500_v48, 1e-16  ;;  %vm1534_vm8 = vcmp.eq.f32.partialorder %v4454_v28, %v1500_v48  ;;  %vm1535_vm9 = vcmp.eq.f32.partialorder %v4459_v44, %v1500_v48  ;;  %v2184_v48 = vld [vmem:[%s4978_s8 + $0x20] sm:$0xff]  ;;  %2782 = vmatpush3.bf16.msra.mxu1 %v2779_v17 }
 0x2f0   : > { %v1497_v46 = vpop.xlane.xlu0 %1496 }
 0x2f1   : > { %v1553_v61 = vmax.f32 %v1497_v46, 1e-16  ;;  %2982 = vrcp.f32 %v1554_v0  ;;  %vm1532_vm10 = vcmp.eq.f32.partialorder %v5163_v31, %v1497_v46  ;;  %vm1533_vm11 = vcmp.eq.f32.partialorder %v5164_v56, %v1497_v46  ;;  %2674 = vmatmul.mubr.msk.f32.gmra.mrb[12].mxu1 %vm1931_vm4, %v1924_v55  ;;  %v2186_v0 = vld [vmem:[%s4978_s8 + $0x30] sm:$0xff] }
 0x2f2   : > { %2676 = vmatprep.mubr.msk.f32.mxu1 %vm1931_vm4, %v1925_v45  ;;  %v2783_v46 = vpack.c.bf16 %v2185_v14, %v2184_v48 }
 0x2f3   : > { %2984 = vrcp.f32 %v1553_v61  ;;  %v2787_v61 = vpack.c.bf16 %v2187_v1, %v2186_v0 }
 0x2f4   : > { %2784 = vmatprep.subr.bf16.mxu1 %v2783_v46 }
 0x2f5   : > { %2677 = vmatmul.mubr.msk.f32.gmra.mrb[14].mxu1 %vm1931_vm4, %v1926_v23 }
 0x2f6   : > { %2786 = vmatpush3.bf16.msra.mxu1 %v2783_v46 }
 0x2f7   : > { %2788 = vmatprep.subr.bf16.mxu1 %v2787_v61 }
 0x2fa   : > { %2790 = vmatpush3.bf16.msra.mxu1 %v2787_v61 }
 0x2fb   : > { %v2983_v15 = vpop.eup %2982 }
 0x2fc   : > { %v1583_v36 = vmul.f32 %v2983_v15, %v5119_v58  ;;  %v2791_v15 = vpack.c.bf16 %v2189_v22, %v2188_v12 }
 0x2fd   : > { %v2985_v18 = vpop.eup %2984 }
 0x2fe   : > { %v1581_v29 = vmul.f32 %v2985_v18, %v5162_v53  ;;  %v1615_v2 = vsel %vm1535_vm9, %v1583_v36, %v5165_v26  ;;  %v1614_v63 = vsel %vm1534_vm8, %v1583_v36, %v5166_v32  ;;  %v2190_v18 = vld [vmem:[%s4978_s8 + $0x50] sm:$0xff]  ;;  %v2191_v36 = vld [vmem:[%s4978_s8 + $0x58] sm:$0xff]  ;;  %2792 = vmatprep.subr.bf16.mxu1 %v2791_v15 }
 0x2ff   : > { %v2795_v31 = vpack.c.bf16 %v2191_v36, %v2190_v18  ;;  %2794 = vmatpush3.bf16.msra.mxu1 %v2791_v15 }
 0x300   : > { %v1613_v6 = vsel %vm1533_vm11, %v1581_v29, %v5167_v16  ;;  %v1612_v58 = vsel %vm1532_vm10, %v1581_v29, %v5168_v49 }
 0x301   : > { %1773 = vmatprep.mubr.f32.mxu0 %v1613_v6  ;;  %2796 = vmatprep.subr.bf16.mxu1 %v2795_v31 }
 0x302   : > { %1774 = vmatmul.mubr.f32.gmra.mrb[22].mxu0 %v1612_v58 }
 0x303   : > { %1778 = vmatprep.mubr.f32.mxu0 %v1615_v2  ;;  %2798 = vmatpush3.bf16.msra.mxu1 %v2795_v31 }
 0x306   : > { %1779 = vmatmul.mubr.f32.gmra.mrb[24].mxu0 %v1614_v63 }
 0x307   : > { %v1506_v28 = vpop.xlane.xlu1 %1505 }
 0x308   : > { %v1503_v44 = vpop.xlane.xlu0 %1502  ;;  %v1556_v35 = vmax.f32 %v1506_v28, 1e-16  ;;  %vm1538_vm12 = vcmp.eq.f32.partialorder %v4496_v62, %v1506_v28  ;;  %vm1539_vm13 = vcmp.eq.f32.partialorder %v4501_v10, %v1506_v28 }
 0x309   : > { %v1555_v54 = vmax.f32 %v1503_v44, 1e-16  ;;  %vm1536_vm14 = vcmp.eq.f32.partialorder %v5169_v51, %v1503_v44  ;;  %vm1537_vm15 = vcmp.eq.f32.partialorder %v5170_v60, %v1503_v44  ;;  %v2192_v44 = vld [vmem:[%s4978_s8 + $0x60] sm:$0xff]  ;;  %v2194_v51 = vld [vmem:[%s4978_s8 + $0x70] sm:$0xff]  ;;  %v2195_v60 = vld [vmem:[%s4978_s8 + $0x78] sm:$0xff] }
 0x30a   : > { %2986 = vrcp.f32 %v1556_v35  ;;  %v2193_v35 = vld [vmem:[%s4978_s8 + $0x68] sm:$0xff] }
 0x30b   : > { %2988 = vrcp.f32 %v1555_v54 }
 0x314   : > { %v2987_v5 = vpop.eup %2986 }
 0x315   : > { %v2989_v40 = vpop.eup %2988  ;;  %v1587_v33 = vmul.f32 %v2987_v5, %v3997_v9  ;;  %v2799_v5 = vpack.c.bf16 %v2193_v35, %v2192_v44 }
 0x316   : > { %v1585_v25 = vmul.f32 %v2989_v40, %v3987_v43 }
 0x317   : > { %v1619_v24 = vsel %vm1539_vm13, %v1587_v33, %v4530_v52  ;;  %v1618_v50 = vsel %vm1538_vm12, %v1587_v33, %v4535_v41  ;;  %v5173_v52 = vld [vmem:[#allocation18_spill] sm:$0xff]  ;;  %v5174_v41 = vld [vmem:[#allocation21_spill] sm:$0xff]  ;;  %2800 = vmatprep.subr.bf16.mxu1 %v2799_v5 }
 0x318   : > { %v1617_v42 = vsel %vm1537_vm15, %v1585_v25, %v5171_v20  ;;  %v1616_v19 = vsel %vm1536_vm14, %v1585_v25, %v5172_v57  ;;  %v1509_v9 = vpop.xlane.xlu0 %1508  ;;  %2802 = vmatpush3.bf16.msra.mxu1 %v2799_v5  ;;  %v2803_v20 = vpack.c.bf16 %v2195_v60, %v2194_v51  ;;  %v4820_v5 = vld [vmem:[%s4977_s7] ss:$0 sm:$0xff] }
 0x319   : > { %1783 = vmatprep.mubr.f32.mxu0 %v1617_v42  ;;  %v1557_v62 = vmax.f32 %v1509_v9, 1e-16  ;;  %vm1540_vm0 = vcmp.eq.f32.partialorder %v4542_v38, %v1509_v9  ;;  %vm1541_vm1 = vcmp.eq.f32.partialorder %v5173_v52, %v1509_v9 }
 0x31a   : > { %1784 = vmatmul.mubr.f32.gmra.mrb[26].mxu0 %v1616_v19  ;;  %2804 = vmatprep.subr.bf16.mxu1 %v2803_v20 }
 0x31b   : > { %1788 = vmatprep.mubr.f32.mxu0 %v1619_v24  ;;  %2990 = vrcp.f32 %v1557_v62 }
 0x31c   : > { %2806 = vmatpush3.bf16.msra.mxu1 %v2803_v20 }
 0x31e   : > { %1789 = vmatmul.mubr.f32.gmra.mrb[28].mxu0 %v1618_v50 }
 0x325   : > { %v2991_v43 = vpop.eup %2990 }
 0x326   : > { %v1589_v10 = vmul.f32 %v2991_v43, %v4057_v8 }
 0x328   : > { %v1621_v4 = vsel %vm1541_vm1, %v1589_v10, %v5174_v41  ;;  %v1620_v37 = vsel %vm1540_vm0, %v1589_v10, %v5175_v7 }
 0x329   : > { %1793 = vmatprep.mubr.f32.mxu0 %v1621_v4 }
 0x32a   : > { %1794 = vmatmul.mubr.f32.gmra.mrb[30].mxu0 %v1620_v37 }
 0x368   : > { %v2547_v59 = vpop.f32.mrb[0].mxu0 }
 0x369   : > { %v2548_v39 = vpop.f32.mrb[1].mxu0 }
 0x36a   : > { %v4695_v47 = vadd.f32 %v2548_v39, %v2547_v59 }
 0x36c   : > { %2992 = vrcp.f32 %v4695_v47 }
 0x373   : > { %v4698_v38 = vpop.f32.mrb[0].mxu1 }
 0x374   : > { %v4700_v21 = vpop.f32.mrb[1].mxu1 }
 0x376   : > { %v2993_v8 = vpop.eup %2992 }
 0x377   : > { %1817 = vperm.xlu1 %2894, %v2993_v8   ;;  %v4765_v50 = vpop.f32.mrb[2].mxu1 }
 0x378   : > { %v4769_v19 = vpop.f32.mrb[3].mxu1 }
 0x37b   : > { %v4774_v52 = vpop.f32.mrb[4].mxu1 }
 0x37c   : > { %v4777_v4 = vpop.f32.mrb[5].mxu1 }
 0x39a   : > { %v2550_v3 = vpop.f32.mrb[2].mxu0 }
 0x39b   : > { %v2551_v55 = vpop.f32.mrb[3].mxu0 }
 0x39c   : > { %v4738_v53 = vadd.f32 %v2551_v55, %v2550_v3 }
 0x39e   : > { %2994 = vrcp.f32 %v4738_v53  ;;  %v2553_v29 = vpop.f32.mrb[4].mxu0 }
 0x39f   : > { %v2554_v56 = vpop.f32.mrb[5].mxu0 }
 0x3a0   : > { %v4741_v26 = vadd.f32 %v2554_v56, %v2553_v29 }
 0x3a2   : > { %2996 = vrcp.f32 %v4741_v26  ;;  %v2556_v2 = vpop.f32.mrb[6].mxu0 }
 0x3a3   : > { %v2557_v32 = vpop.f32.mrb[7].mxu0 }
 0x3a4   : > { %v4744_v63 = vadd.f32 %v2557_v32, %v2556_v2 }
 0x3a6   : > { %2998 = vrcp.f32 %v4744_v63  ;;  %v2559_v16 = vpop.f32.mrb[8].mxu0 }
 0x3a7   : > { %v2560_v6 = vpop.f32.mrb[9].mxu0 }
 0x3a8   : > { %v2995_v49 = vpop.eup %2994  ;;  %v4747_v58 = vadd.f32 %v2560_v6, %v2559_v16 }
 0x3a9   : > { %1822 = vperm.xlu0 %2895, %v2995_v49  }
 0x3aa   : > { %3000 = vrcp.f32 %v4747_v58  ;;  %v2562_v28 = vpop.f32.mrb[10].mxu0 }
 0x3ab   : > { %v2563_v54 = vpop.f32.mrb[11].mxu0 }
 0x3ac   : > { %v2997_v40 = vpop.eup %2996  ;;  %v4756_v33 = vadd.f32 %v2563_v54, %v2562_v28 }
 0x3ad   : > { %1827 = vperm.xlu1 %2894, %v2997_v40  }
 0x3ae   : > { %3002 = vrcp.f32 %v4756_v33  ;;  %v2565_v25 = vpop.f32.mrb[12].mxu0 }
 0x3af   : > { %v2566_v24 = vpop.f32.mrb[13].mxu0 }
 0x3b0   : > { %v2999_v42 = vpop.eup %2998  ;;  %v4767_v57 = vadd.f32 %v2566_v24, %v2565_v25 }
 0x3b1   : > { %1832 = vperm.xlu1 %2894, %v2999_v42  }
 0x3b2   : > { %3004 = vrcp.f32 %v4767_v57  ;;  %v2568_v9 = vpop.f32.mrb[14].mxu0 }
 0x3b3   : > { %v2569_v62 = vpop.f32.mrb[15].mxu0 }
 0x3b4   : > { %v3001_v43 = vpop.eup %3000  ;;  %v4772_v10 = vadd.f32 %v2569_v62, %v2568_v9 }
 0x3b5   : > { %1837 = vperm.xlu1 %2894, %v3001_v43  }
 0x3b6   : > { %3006 = vrcp.f32 %v4772_v10  ;;  %v2571_v41 = vpop.f32.mrb[16].mxu0 }
 0x3b7   : > { %v2572_v7 = vpop.f32.mrb[17].mxu0 }
 0x3b8   : > { %v3003_v37 = vpop.eup %3002  ;;  %v4779_v45 = vadd.f32 %v2572_v7, %v2571_v41  ;;  %v4787_v11 = vpop.f32.mrb[6].mxu1 }
 0x3b9   : > { %1842 = vperm.xlu1 %2894, %v3003_v37   ;;  %v4789_v17 = vpop.f32.mrb[7].mxu1 }
 0x3ba   : > { %3008 = vrcp.f32 %v4779_v45 }
 0x3bb   : > { %v2574_v23 = vpop.f32.mrb[18].mxu0 }
 0x3bc   : > { %v3005_v59 = vpop.eup %3004  ;;  %v2575_v39 = vpop.f32.mrb[19].mxu0 }
 0x3bd   : > { %v4782_v8 = vadd.f32 %v2575_v39, %v2574_v23  ;;  %1847 = vperm.xlu1 %2894, %v3005_v59   ;;  %v4792_v14 = vpop.f32.mrb[8].mxu1 }
 0x3be   : > { %v4794_v46 = vpop.f32.mrb[9].mxu1 }
 0x3bf   : > { %3010 = vrcp.f32 %v4782_v8  ;;  %v2577_v30 = vpop.f32.mrb[20].mxu0 }
 0x3c0   : > { %v3007_v34 = vpop.eup %3006  ;;  %v2578_v13 = vpop.f32.mrb[21].mxu0 }
 0x3c1   : > { %v4785_v27 = vadd.f32 %v2578_v13, %v2577_v30  ;;  %1852 = vperm.xlu1 %2894, %v3007_v34   ;;  %v4796_v61 = vpop.f32.mrb[10].mxu1 }
 0x3c2   : > { %v4798_v12 = vpop.f32.mrb[11].mxu1 }
 0x3c3   : > { %3012 = vrcp.f32 %v4785_v27 }
 0x3c4   : > { %v3009_v48 = vpop.eup %3008  ;;  %v4806_v56 = vpop.f32.mrb[12].mxu1 }
 0x3c5   : > { %1857 = vperm.xlu1 %2894, %v3009_v48   ;;  %v4808_v2 = vpop.f32.mrb[13].mxu1 }
 0x3c9   : > { %v3011_v0 = vpop.eup %3010 }
 0x3ca   : > { %1862 = vperm.xlu1 %2894, %v3011_v0  }
 0x3cd   : > { %v3013_v1 = vpop.eup %3012 }
 0x3ce   : > { %1867 = vperm.xlu0 %2895, %v3013_v1  }
 0x3d5   : > { %v2580_v22 = vpop.f32.mrb[22].mxu0 }
 0x3d6   : > { %v2581_v3 = vpop.f32.mrb[23].mxu0 }
 0x3d7   : > { %v4800_v15 = vadd.f32 %v2581_v3, %v2580_v22 }
 0x3d9   : > { %3014 = vrcp.f32 %v4800_v15  ;;  %v2583_v55 = vpop.f32.mrb[24].mxu0 }
 0x3da   : > { %v2584_v18 = vpop.f32.mrb[25].mxu0 }
 0x3db   : > { %v4803_v36 = vadd.f32 %v2584_v18, %v2583_v55 }
 0x3dd   : > { %3016 = vrcp.f32 %v4803_v36 }
 0x3e3   : > { %v3015_v29 = vpop.eup %3014 }
 0x3e4   : > { %1872 = vperm.xlu1 %2894, %v3015_v29  }
 0x3e7   : > { %v3017_v31 = vpop.eup %3016 }
 0x3e8   : > { %1877 = vperm.xlu0 %2895, %v3017_v31  }
 0x3ed   : > { %v2586_v32 = vpop.f32.mrb[26].mxu0 }
 0x3ee   : > { %v2587_v16 = vpop.f32.mrb[27].mxu0 }
 0x3ef   : > { %v4810_v6 = vadd.f32 %v2587_v16, %v2586_v32 }
 0x3f1   : > { %3018 = vrcp.f32 %v4810_v6  ;;  %v2589_v49 = vpop.f32.mrb[28].mxu0 }
 0x3f2   : > { %v2590_v28 = vpop.f32.mrb[29].mxu0 }
 0x3f3   : > { %v4813_v44 = vadd.f32 %v2590_v28, %v2589_v49 }
 0x3f5   : > { %3020 = vrcp.f32 %v4813_v44 }
 0x3f6   : > { %v1818_v35 = vpop.permute.xlu1 %1817 }
 0x3f7   : > { %v1895_v54 = vmul.f32 %v4695_v47, %v1818_v35  ;;  %v4827_v47 = vpop.f32.mrb[14].mxu1 }
 0x3f8   : > { %v4829_v62 = vpop.f32.mrb[15].mxu1 }
 0x3f9   : > { %v2125_v40 = vadd.f32 %v4700_v21, %v1895_v54 }
 0x3fb   : > { %v3019_v25 = vpop.eup %3018  ;;  %v2148_v51 = vadd.f32 %v4820_v5, %v2125_v40 }
 0x3fc   : > { %1882 = vperm.xlu1 %2894, %v3019_v25  }
 0x3fd   : > { %v2164_v60 = vmax.f32 %v2148_v51, 0.0  ;;  %v2592_v24 = vpop.f32.mrb[30].mxu0 }
 0x3fe   : > { %v2593_v42 = vpop.f32.mrb[31].mxu0 }
 0x3ff   : > { %v3021_v20 = vpop.eup %3020  ;;  %v4824_v9 = vadd.f32 %v2593_v42, %v2592_v24  ;;  %2711 = vmatprep.mubr.f32.mxu1 %v2164_v60 }
 0x400   : > { %1887 = vperm.xlu0 %2895, %v3021_v20  }
 0x401   : > { %3022 = vrcp.f32 %v4824_v9 }
 0x40b   : > { %v3023_v43 = vpop.eup %3022 }
 0x40c   : > { %1892 = vperm.xlu1 %2894, %v3023_v43  }
 0x428   : > { %v1823_v21 = vpop.permute.xlu0 %1822 }
 0x429   : > { %v1896_v41 = vmul.f32 %v4738_v53, %v1823_v21 }
 0x42b   : > { %v2126_v7 = vadd.f32 %v4698_v38, %v1896_v41 }
 0x42c   : > { %v1828_v37 = vpop.permute.xlu1 %1827 }
 0x42d   : > { %v2149_v23 = vadd.f32 %v4820_v5, %v2126_v7  ;;  %v1897_v59 = vmul.f32 %v4741_v26, %v1828_v37 }
 0x42f   : > { %v2165_v39 = vmax.f32 %v2149_v23, 0.0  ;;  %v2127_v30 = vadd.f32 %v4769_v19, %v1897_v59 }
 0x430   : > { %v1833_v34 = vpop.permute.xlu1 %1832 }
 0x431   : > { %v2150_v13 = vadd.f32 %v4820_v5, %v2127_v30  ;;  %v1898_v48 = vmul.f32 %v4744_v63, %v1833_v34  ;;  %2712 = vmatmul.mubr.f32.vlgmr.msra.gmra.mrb[16].mxu1 %v2165_v39 }
 0x433   : > { %v2166_v0 = vmax.f32 %v2150_v13, 0.0  ;;  %v2128_v1 = vadd.f32 %v4765_v50, %v1898_v48 }
 0x434   : > { %v1838_v53 = vpop.permute.xlu1 %1837 }
 0x435   : > { %v1899_v38 = vmul.f32 %v4747_v58, %v1838_v53  ;;  %2714 = vmatprep.mubr.f32.mxu1 %v2166_v0  ;;  %v2151_v22 = vadd.f32 %v4820_v5, %v2128_v1 }
 0x437   : > { %v2129_v26 = vadd.f32 %v4777_v4, %v1899_v38  ;;  %v2167_v3 = vmax.f32 %v2151_v22, 0.0 }
 0x438   : > { %v1843_v55 = vpop.permute.xlu1 %1842 }
 0x439   : > { %v2152_v19 = vadd.f32 %v4820_v5, %v2129_v26  ;;  %v1900_v18 = vmul.f32 %v4756_v33, %v1843_v55  ;;  %2715 = vmatmul.mubr.f32.gmra.mrb[18].mxu1 %v2167_v3 }
 0x43b   : > { %v2168_v63 = vmax.f32 %v2152_v19, 0.0  ;;  %v2130_v29 = vadd.f32 %v4774_v52, %v1900_v18 }
 0x43c   : > { %v1848_v31 = vpop.permute.xlu1 %1847 }
 0x43d   : > { %v1901_v50 = vmul.f32 %v4767_v57, %v1848_v31  ;;  %2717 = vmatprep.mubr.f32.mxu1 %v2168_v63  ;;  %v2153_v58 = vadd.f32 %v4820_v5, %v2130_v29 }
 0x43f   : > { %v2131_v32 = vadd.f32 %v4789_v17, %v1901_v50  ;;  %v2169_v16 = vmax.f32 %v2153_v58, 0.0 }
 0x440   : > { %v1853_v4 = vpop.permute.xlu1 %1852 }
 0x441   : > { %v2154_v49 = vadd.f32 %v4820_v5, %v2131_v32  ;;  %v1902_v28 = vmul.f32 %v4772_v10, %v1853_v4  ;;  %2718 = vmatmul.mubr.f32.gmra.mrb[20].mxu1 %v2169_v16 }
 0x443   : > { %v2170_v33 = vmax.f32 %v2154_v49, 0.0  ;;  %v2132_v35 = vadd.f32 %v4787_v11, %v1902_v28 }
 0x444   : > { %v1858_v54 = vpop.permute.xlu1 %1857 }
 0x445   : > { %v1903_v52 = vmul.f32 %v4779_v45, %v1858_v54  ;;  %2720 = vmatprep.mubr.f32.mxu1 %v2170_v33  ;;  %v2155_v57 = vadd.f32 %v4820_v5, %v2132_v35 }
 0x447   : > { %v2133_v40 = vadd.f32 %v4794_v46, %v1903_v52  ;;  %v2171_v25 = vmax.f32 %v2155_v57, 0.0 }
 0x449   : > { %v2156_v17 = vadd.f32 %v4820_v5, %v2133_v40  ;;  %v1863_v51 = vpop.permute.xlu1 %1862  ;;  %2721 = vmatmul.mubr.f32.gmra.mrb[22].mxu1 %v2171_v25 }
 0x44a   : > { %v1904_v60 = vmul.f32 %v4782_v8, %v1863_v51 }
 0x44b   : > { %v2172_v10 = vmax.f32 %v2156_v17, 0.0 }
 0x44c   : > { %v2134_v24 = vadd.f32 %v4792_v14, %v1904_v60 }
 0x44d   : > { %v1868_v20 = vpop.permute.xlu0 %1867  ;;  %2723 = vmatprep.mubr.f32.mxu1 %v2172_v10 }
 0x44e   : > { %v1905_v11 = vmul.f32 %v4785_v27, %v1868_v20  ;;  %v2157_v45 = vadd.f32 %v4820_v5, %v2134_v24 }
 0x450   : > { %v2135_v42 = vadd.f32 %v4798_v12, %v1905_v11  ;;  %v2173_v43 = vmax.f32 %v2157_v45, 0.0 }
 0x452   : > { %v2158_v46 = vadd.f32 %v4820_v5, %v2135_v42  ;;  %2724 = vmatmul.mubr.f32.gmra.mrb[24].mxu1 %v2173_v43 }
 0x454   : > { %v2174_v21 = vmax.f32 %v2158_v46, 0.0 }
 0x456   : > { %2726 = vmatprep.mubr.f32.mxu1 %v2174_v21 }
 0x463   : > { %v1873_v41 = vpop.permute.xlu1 %1872 }
 0x464   : > { %v1906_v8 = vmul.f32 %v4800_v15, %v1873_v41 }
 0x466   : > { %v2136_v7 = vadd.f32 %v4796_v61, %v1906_v8 }
 0x467   : > { %v1878_v14 = vpop.permute.xlu0 %1877 }
 0x468   : > { %v1907_v37 = vmul.f32 %v4803_v36, %v1878_v14  ;;  %v2159_v27 = vadd.f32 %v4820_v5, %v2136_v7 }
 0x46a   : > { %v2137_v23 = vadd.f32 %v4808_v2, %v1907_v37  ;;  %v2175_v59 = vmax.f32 %v2159_v27, 0.0 }
 0x46c   : > { %v2160_v12 = vadd.f32 %v4820_v5, %v2137_v23  ;;  %2727 = vmatmul.mubr.f32.gmra.mrb[26].mxu1 %v2175_v59 }
 0x46e   : > { %v2176_v39 = vmax.f32 %v2160_v12, 0.0 }
 0x470   : > { %2729 = vmatprep.mubr.f32.mxu1 %v2176_v39 }
 0x47b   : > { %v1883_v30 = vpop.permute.xlu1 %1882 }
 0x47c   : > { %v1908_v34 = vmul.f32 %v4810_v6, %v1883_v30 }
 0x47e   : > { %v2138_v15 = vadd.f32 %v4806_v56, %v1908_v34 }
 0x47f   : > { %v1888_v61 = vpop.permute.xlu0 %1887 }
 0x480   : > { %v1909_v13 = vmul.f32 %v4813_v44, %v1888_v61  ;;  %v2161_v36 = vadd.f32 %v4820_v5, %v2138_v15  ;;  %v4880_v44 = vld [vmem:[%s4979_s9] ss:$0 sm:$0xff] }
 0x482   : > { %v2139_v2 = vadd.f32 %v4829_v62, %v1909_v13  ;;  %v2177_v48 = vmax.f32 %v2161_v36, 0.0 }
 0x484   : > { %v2162_v0 = vadd.f32 %v4820_v5, %v2139_v2  ;;  %2730 = vmatmul.mubr.f32.gmra.mrb[28].mxu1 %v2177_v48 }
 0x486   : > { %v2178_v1 = vmax.f32 %v2162_v0, 0.0 }
 0x488   : > { %2732 = vmatprep.mubr.f32.mxu1 %v2178_v1 }
 0x48b   : > { %v1893_v53 = vpop.permute.xlu1 %1892 }
 0x48c   : > { %v1910_v6 = vmul.f32 %v4824_v9, %v1893_v53 }
 0x48e   : > { %v2140_v56 = vadd.f32 %v4827_v47, %v1910_v6 }
 0x490   : > { %v2163_v38 = vadd.f32 %v4820_v5, %v2140_v56 }
 0x492   : > { %v2179_v22 = vmax.f32 %v2163_v38, 0.0 }
 0x494   : > { %2733 = vmatmul.mubr.f32.gmra.mrb[30].mxu1 %v2179_v22 }
 0x504   : > { %v2713_v62 = vpop.f32.mrb[16].mxu1 }
 0x505   : > { %v2275_v26 = vadd.f32 %v2713_v62, %v4880_v44  ;;  %v2269_v3 = vpop.f32.mrb[17].mxu1 }
 0x506   : > { %v2270_v9 = vadd.f32 %v4880_v44, %v2269_v3 }
 0x507   : > { %v2349_v55 = vmax.f32 %v2275_v26, 0.0 }
 0x508   : > { %v2348_v47 = vmax.f32 %v2270_v9, 0.0 }
 0x509   : > { %2365 = vst [vmem:[%s4886_s1 + $0x8] sm:$0xff] %v2349_v55 }
 0x50a   : > { %2364 = vst [vmem:[%s4886_s1] sm:$0xff] %v2348_v47 }
 0x50c   : > { %v2716_v5 = vpop.f32.mrb[18].mxu1 }
 0x50d   : > { %v2285_v19 = vadd.f32 %v2716_v5, %v4880_v44  ;;  %v2279_v18 = vpop.f32.mrb[19].mxu1 }
 0x50e   : > { %v2280_v63 = vadd.f32 %v4880_v44, %v2279_v18 }
 0x50f   : > { %v2351_v29 = vmax.f32 %v2285_v19, 0.0 }
 0x510   : > { %v2350_v31 = vmax.f32 %v2280_v63, 0.0 }
 0x511   : > { %2367 = vst [vmem:[%s4886_s1 + $0x18] sm:$0xff] %v2351_v29 }
 0x512   : > { %2366 = vst [vmem:[%s4886_s1 + $0x10] sm:$0xff] %v2350_v31 }
 0x514   : > { %v2719_v50 = vpop.f32.mrb[20].mxu1 }
 0x515   : > { %v2295_v58 = vadd.f32 %v2719_v50, %v4880_v44  ;;  %v2289_v32 = vpop.f32.mrb[21].mxu1 }
 0x516   : > { %v2290_v16 = vadd.f32 %v4880_v44, %v2289_v32 }
 0x517   : > { %v2353_v4 = vmax.f32 %v2295_v58, 0.0 }
 0x518   : > { %v2352_v49 = vmax.f32 %v2290_v16, 0.0 }
 0x519   : > { %2369 = vst [vmem:[%s4886_s1 + $0x28] sm:$0xff] %v2353_v4 }
 0x51a   : > { %2368 = vst [vmem:[%s4886_s1 + $0x20] sm:$0xff] %v2352_v49 }
 0x51c   : > { %v2722_v28 = vpop.f32.mrb[22].mxu1 }
 0x51d   : > { %v2305_v33 = vadd.f32 %v2722_v28, %v4880_v44  ;;  %v2299_v35 = vpop.f32.mrb[23].mxu1 }
 0x51e   : > { %v2300_v54 = vadd.f32 %v4880_v44, %v2299_v35 }
 0x51f   : > { %v2355_v52 = vmax.f32 %v2305_v33, 0.0 }
 0x520   : > { %v2354_v57 = vmax.f32 %v2300_v54, 0.0 }
 0x521   : > { %2371 = vst [vmem:[%s4886_s1 + $0x38] sm:$0xff] %v2355_v52 }
 0x522   : > { %2370 = vst [vmem:[%s4886_s1 + $0x30] sm:$0xff] %v2354_v57 }
 0x525   : > { %v2725_v40 = vpop.f32.mrb[24].mxu1 }
 0x526   : > { %v2315_v25 = vadd.f32 %v2725_v40, %v4880_v44  ;;  %v2309_v17 = vpop.f32.mrb[25].mxu1 }
 0x527   : > { %v2310_v51 = vadd.f32 %v4880_v44, %v2309_v17 }
 0x528   : > { %v2357_v60 = vmax.f32 %v2315_v25, 0.0 }
 0x529   : > { %v2356_v10 = vmax.f32 %v2310_v51, 0.0 }
 0x52a   : > { %2373 = vst [vmem:[%s4886_s1 + $0x48] sm:$0xff] %v2357_v60 }
 0x52b   : > { %2372 = vst [vmem:[%s4886_s1 + $0x40] sm:$0xff] %v2356_v10 }
 0x53f   : > { %v2728_v24 = vpop.f32.mrb[26].mxu1 }
 0x540   : > { %v2325_v20 = vadd.f32 %v2728_v24, %v4880_v44  ;;  %v2319_v11 = vpop.f32.mrb[27].mxu1 }
 0x541   : > { %v2320_v45 = vadd.f32 %v4880_v44, %v2319_v11 }
 0x542   : > { %v2359_v42 = vmax.f32 %v2325_v20, 0.0 }
 0x543   : > { %v2358_v43 = vmax.f32 %v2320_v45, 0.0 }
 0x544   : > { %2375 = vst [vmem:[%s4886_s1 + $0x58] sm:$0xff] %v2359_v42 }
 0x545   : > { %2374 = vst [vmem:[%s4886_s1 + $0x50] sm:$0xff] %v2358_v43 }
 0x557   : > { %v2731_v46 = vpop.f32.mrb[28].mxu1 }
 0x558   : > { %v2335_v21 = vadd.f32 %v2731_v46, %v4880_v44  ;;  %v2329_v41 = vpop.f32.mrb[29].mxu1 }
 0x559   : > { %v2330_v8 = vadd.f32 %v4880_v44, %v2329_v41 }
 0x55a   : > { %v2361_v7 = vmax.f32 %v2335_v21, 0.0 }
 0x55b   : > { %v2360_v14 = vmax.f32 %v2330_v8, 0.0 }
 0x55c   : > { %2377 = vst [vmem:[%s4886_s1 + $0x68] sm:$0xff] %v2361_v7 }
 0x55d   : > { %2376 = vst [vmem:[%s4886_s1 + $0x60] sm:$0xff] %v2360_v14 }
 0x567   : > { %v2734_v37 = vpop.f32.mrb[30].mxu1 }
 0x568   : > { %v2345_v27 = vadd.f32 %v2734_v37, %v4880_v44  ;;  %v2339_v23 = vpop.f32.mrb[31].mxu1 }
 0x569   : > { %v2340_v59 = vadd.f32 %v4880_v44, %v2339_v23 }
 0x56a   : > { %v2363_v12 = vmax.f32 %v2345_v27, 0.0 }
 0x56b   : > { %v2362_v39 = vmax.f32 %v2340_v59, 0.0 }
 0x56c   : > { %2379 = vst [vmem:[%s4886_s1 + $0x78] sm:$0xff] %v2363_v12 }
 0x56d   : > { %2378 = vst [vmem:[%s4886_s1 + $0x70] sm:$0xff] %v2362_v39 }
 0x56e   : > { %3037 = shalt.err (!%p3034_p3)
}
 0x56f   : > { %s3038_s21 = scalar_lea.hbm %s4921_s12, 2048  ;;  %s3042_s28 = scalar_lea.hbm %s4980_s10, 6144 }
 0x570   : > { %p3039_p4 = scmp.ne.s32.totalorder %s4921_s12, %s3038_s21  ;;  %p3043_p9 = scmp.lt.u32.totalorder %s4921_s12, %s4980_s10 }
 0x571   : > { %p3044_p10 = scmp.lt.u32.totalorder %s3042_s28, %s3038_s21  ;;  %p3046_p12 = scmp.lt.u32.totalorder %s3038_s21, %s4921_s12 }
 0x572   : > { %p3040_p7 = pnand %p3039_p4, %p3188_p5 }
 0x573   : > { %p3045_p11 = por %p3044_p10, %p3043_p9 }
 0x574   : > { %p3041_p8 = pneg %p3040_p7 }
 0x575   : > { %p3047_p13 = por %p3046_p12, %p3045_p11 }
 0x577   : > { %p3048_p0 = pnand %p3047_p13, %p3041_p8 }
 0x579   : > { %3051 = shalt.err (!%p3048_p0)
}
 0x57a   : > { %s3093_s18 = smov 128   ;;  %s3094_s20 = smov 8  }
 0x57b   : > { %2807 = dma.vmem_to_hbm [thread:$0]  (%p3188_p5), %s4923_s29, 2048, %s4921_s12, %s4929_s17, %s3093_s18, %s3093_s18, %s3094_s20  }
 0x57c PF: > { %p2813_p1 = scmp.ge.s32.totalorder %s3086_s16, 2  ;;  %s2409_s25 = sand.u32 1, %s3074_s13  }
 0x57d   : > { %s2410_s26 = scalar_lea.sflag [#allocation3], %s2409_s25 }
 0x57e   : > { %p2810_p2 = pnand %p2813_p1, %p3192_p6 }
 0x580   : > { %3069 = dma.done.wait (!%p2810_p2), %s2410_s26, 2048  }
 0x581   : > { %3071 = vsyncadd (!%p2810_p2), %s2410_s26, 4294965248  ;;  %p20_p3 = scmp.ge.s32.totalorder %s3175_s19, 5   ;;  %s5176_s13 = smov %s3078_s14 }
 0x582   : > { %s5177_s14 = smov %s3082_s15  ;;  %s5178_s15 = smov %s3186_s22 }
 0x583   : > { %s5179_s16 = smov %s3175_s19  ;;  %22 = sbr.rel (!%p20_p3) target bundleno = 5 (0x5), region = 101 }
 0x58a   :  { %2415 = vsyncpa [#allocation3], 1 }
 0x58b   :  { %2417 = vsyncpa [#allocation3 + $0x1], 1 }

</bundles_post_ra>
